<compile_context>
chip_gen: v5e
topology: v5e:2x2
jax: 0.10.0
libtpu: 0.0.40
codegen_flags: <defaults>
</compile_context>

<pallas_src>
import functools

import jax
import jax.numpy as jnp
import numpy as np
from jax import lax
from jax.experimental import pallas as pl
from jax.experimental.pallas import tpu as pltpu

LANES = 128


def _round_up(x, m):
    return ((x + m - 1) // m) * m


# ----------------------------- Pallas kernels ------------------------------ #

def _conv_relu_pool_kernel(p_ref, w_ref, b_ref, o_ref, *, rows):
    # p_ref: (1, 4*rows, K)  pool-ordered im2col patches (corner-major rows), bf16
    # w_ref: (K, 128)        conv weight, out-channels zero-padded to 128 lanes, bf16
    # b_ref: (1, 128)        bias, zero-padded, f32
    # o_ref: (1, rows, 128)  pooled + bias + ReLU conv output, bf16
    # bf16 x bf16 -> f32 accumulate on the MXU.
    y = jnp.dot(p_ref[0], w_ref[...], preferred_element_type=jnp.float32)
    # Pool max FIRST (bias is per-lane and identical across the 4 corners, so
    # max / bias / ReLU commute); bias + ReLU then touch only rows*128 elems.
    pooled = jnp.maximum(
        jnp.maximum(y[0 * rows:1 * rows], y[1 * rows:2 * rows]),
        jnp.maximum(y[2 * rows:3 * rows], y[3 * rows:4 * rows]))
    o_ref[0] = jnp.maximum(pooled + b_ref[...], 0.0).astype(o_ref.dtype)


def conv_relu_pool(p, w, b, *, rows):
    """p: (G, 4*rows, K) bf16, w: (K, 128) bf16, b: (1, 128) f32 -> (G, rows, 128) bf16."""
    G, M4, K = p.shape
    F = w.shape[1]
    kernel = functools.partial(_conv_relu_pool_kernel, rows=rows)
    return pl.pallas_call(
        kernel,
        out_shape=jax.ShapeDtypeStruct((G, rows, F), jnp.bfloat16),
        grid=(G,),
        in_specs=[
            pl.BlockSpec((1, M4, K), lambda g: (g, 0, 0)),
            pl.BlockSpec((K, F), lambda g: (0, 0)),
            pl.BlockSpec((1, F), lambda g: (0, 0)),
        ],
        out_specs=pl.BlockSpec((1, rows, F), lambda g: (g, 0, 0)),
        compiler_params=pltpu.CompilerParams(
            dimension_semantics=("parallel",)),
    )(p, w, b)


def _fc_stack_kernel(x_ref, w1_ref, b1_ref, w2_ref, b2_ref, w3_ref, b3_ref, o_ref):
    # fc1 + ReLU + fc2 + ReLU + fc3; bf16 operands (~170 KB of weights, all
    # VMEM-resident), f32 accumulation and f32 elementwise epilogue.
    h = jnp.dot(x_ref[...], w1_ref[...], preferred_element_type=jnp.float32)
    h = jnp.maximum(h + b1_ref[...], 0.0)
    h = jnp.dot(h.astype(jnp.bfloat16), w2_ref[...],
                preferred_element_type=jnp.float32)
    h = jnp.maximum(h + b2_ref[...], 0.0)
    h = jnp.dot(h.astype(jnp.bfloat16), w3_ref[...],
                preferred_element_type=jnp.float32)
    o_ref[...] = (h + b3_ref[...]).astype(o_ref.dtype)


def fc_stack(flat, fw1, fb1, fw2, fb2, fw3, fb3):
    """flat: (N, 400) -> (N, 128) f32 with valid logits in columns [:10]."""
    N, K = flat.shape
    npad = _round_up(N, 8)
    kpad = _round_up(K, LANES)                                # 400 -> 512
    xp = _pad2d(flat, npad, kpad).astype(jnp.bfloat16)
    w1p = _pad2d(fw1.T, kpad, LANES).astype(jnp.bfloat16)     # (512, 128)
    b1p = _pad2d(fb1.reshape(1, -1), 1, LANES)                # f32
    w2p = _pad2d(fw2.T, LANES, LANES).astype(jnp.bfloat16)    # (128, 128)
    b2p = _pad2d(fb2.reshape(1, -1), 1, LANES)
    w3p = _pad2d(fw3.T, LANES, LANES).astype(jnp.bfloat16)    # (128, 128)
    b3p = _pad2d(fb3.reshape(1, -1), 1, LANES)

    vmem = pl.BlockSpec(memory_space=pltpu.MemorySpace.VMEM)
    out = pl.pallas_call(                 # grid-free: single step, whole arrays in VMEM
        _fc_stack_kernel,
        out_shape=jax.ShapeDtypeStruct((npad, LANES), jnp.float32),
        in_specs=[vmem] * 7,
        out_specs=vmem,
    )(xp, w1p, b1p, w2p, b2p, w3p, b3p)
    return out[:N]


# ------------------------------ JAX glue ----------------------------------- #

def _pad2d(a, rows, cols):
    r, c = a.shape
    return jnp.pad(a, ((0, rows - r), (0, cols - c)))


def _pool_ordered_patches(x_nhwc, kh, kw, batch_block, kpad):
    """Corner-major, batch-folded im2col for the fused conv+ReLU+maxpool kernel.

    Returns (P, m, mpad, G) with P of shape (G, 4*B*mpad, kpad) bf16 where
    row = corner*(B*mpad) + local_image*mpad + pooled_position, so the 2x2 pool
    is an elementwise max of 4 contiguous, sublane-aligned row blocks of the
    (4*B*mpad, kpad) @ (kpad, 128) matmul result.  m = Hp*Wp (floor pooling),
    mpad = m rounded up to 8, G = number of batch blocks of size B.
    """
    N, H, W, C = x_nhwc.shape
    Ho, Wo = H - kh + 1, W - kw + 1
    Hp, Wp = Ho // 2, Wo // 2
    K = kh * kw * C
    m = Hp * Wp
    mpad = _round_up(m, 8)
    B = batch_block
    G = pl.cdiv(N, B)
    cols = [x_nhwc[:, dy:dy + Ho, dx:dx + Wo, :]
            for dy in range(kh) for dx in range(kw)]
    pg = jnp.concatenate(cols, axis=-1)           # (N, Ho, Wo, K), lane order (dy,dx,ci)
    corners = []
    for a in (0, 1):
        for b in (0, 1):
            blk = pg[:, a:a + 2 * Hp:2, b:b + 2 * Wp:2, :].reshape(N, m, K)
            blk = jnp.pad(blk, ((0, G * B - N), (0, mpad - m), (0, kpad - K)))
            corners.append(blk)
    P = jnp.stack(corners, axis=0)                # (4, G*B, mpad, kpad)
    P = P.reshape(4, G, B * mpad, kpad)
    P = jnp.transpose(P, (1, 0, 2, 3)).reshape(G, 4 * B * mpad, kpad)
    return P.astype(jnp.bfloat16), m, mpad, G


def init_params(key):
    ks = jax.random.split(key, 10)

    def u(k, shape, fan_in):
        bound = 1.0 / np.sqrt(fan_in)
        return jax.random.uniform(k, shape, jnp.float32, -bound, bound)

    w1 = u(ks[0], (6, 1, 3, 3), 1 * 9)       # torch Conv2d weight layout (O, I, KH, KW)
    b1 = u(ks[1], (6,), 1 * 9)
    w2 = u(ks[2], (16, 6, 3, 3), 6 * 9)
    b2 = u(ks[3], (16,), 6 * 9)
    fw1 = u(ks[4], (120, 400), 400)          # torch Linear weight layout (out, in)
    fb1 = u(ks[5], (120,), 400)
    fw2 = u(ks[6], (84, 120), 120)
    fb2 = u(ks[7], (84,), 120)
    fw3 = u(ks[8], (10, 84), 84)
    fb3 = u(ks[9], (10,), 84)
    return (w1, b1, w2, b2, fw1, fb1, fw2, fb2, fw3, fb3)


def lenet_pallas(x_nchw, params, *, batch_block=8):
    (w1, b1, w2, b2, fw1, fb1, fw2, fb2, fw3, fb3) = params
    N = x_nchw.shape[0]
    B = min(batch_block, N)                  # images folded into one grid step
    x = jnp.transpose(x_nchw, (0, 2, 3, 1)).astype(jnp.float32)   # NCHW -> NHWC

    # stage 1: conv1 (1->6, 3x3) + ReLU + 2x2 max-pool, one grid step per B images
    p1, m1, mpad1, G = _pool_ordered_patches(x, 3, 3, B, kpad=16)
    w1m = jnp.transpose(w1, (2, 3, 1, 0)).reshape(3 * 3 * 1, 6)
    y1 = conv_relu_pool(
        p1, _pad2d(w1m, 16, LANES).astype(jnp.bfloat16),
        _pad2d(b1.reshape(1, 6), 1, LANES), rows=B * mpad1)
    y1p = y1.reshape(G * B, mpad1, LANES)[:N, :m1, :6].reshape(N, 13, 13, 6)

    # stage 2: conv2 (6->16, 3x3) + ReLU + 2x2 max-pool (floor), same structure
    p2, m2, mpad2, G = _pool_ordered_patches(y1p, 3, 3, B, kpad=LANES)
    w2m = jnp.transpose(w2, (2, 3, 1, 0)).reshape(3 * 3 * 6, 16)
    y2 = conv_relu_pool(
        p2, _pad2d(w2m, LANES, LANES).astype(jnp.bfloat16),
        _pad2d(b2.reshape(1, 16), 1, LANES), rows=B * mpad2)
    y2p = y2.reshape(G * B, mpad2, LANES)[:N, :m2, :16].reshape(N, 5, 5, 16)

    # flatten in torch NCHW order: (N, C, H, W) -> (N, 400)
    flat = jnp.transpose(y2p, (0, 3, 1, 2)).reshape(N, 400)

    # fc1 + ReLU + fc2 + ReLU + fc3 in a single grid-free kernel
    out = fc_stack(flat, fw1, fb1, fw2, fb2, fw3, fb3)
    return out[:, :10]


def lenet_reference(x_nchw, params):
    """Pure-JAX f32 reference matching PyTorch semantics (NCHW)."""
    (w1, b1, w2, b2, fw1, fb1, fw2, fb2, fw3, fb3) = params

    def conv(x, w, b):
        y = lax.conv_general_dilated(
            x, w, window_strides=(1, 1), padding="VALID",
            dimension_numbers=("NCHW", "OIHW", "NCHW"))
        return y + b[None, :, None, None]

    def pool(x):
        return lax.reduce_window(x, -jnp.inf, lax.max,
                                 (1, 1, 2, 2), (1, 1, 2, 2), "VALID")

    y = pool(jnp.maximum(conv(x_nchw, w1, b1), 0.0))
    y = pool(jnp.maximum(conv(y, w2, b2), 0.0))
    y = y.reshape(y.shape[0], -1)
    y = jnp.maximum(y @ fw1.T + fb1, 0.0)
    y = jnp.maximum(y @ fw2.T + fb2, 0.0)
    return y @ fw3.T + fb3


if __name__ == "__main__":
    key = jax.random.PRNGKey(0)
    kx, kp = jax.random.split(key)
    params = init_params(kp)
    x = jax.random.normal(kx, (2, 1, 28, 28), jnp.float32)   # NCHW, like the torch module

    out = jax.jit(lenet_pallas)(x, params)
    out = jax.block_until_ready(out)

    ref = lenet_reference(x, params)
    assert out.shape == (2, 10)
    # bf16 matmul operands with f32 accumulation: compare at ~1e-2 level.
    np.testing.assert_allclose(np.asarray(out), np.asarray(ref), rtol=2e-2, atol=2e-2)
    print("KERNEL_OK")
</pallas_src>

<mosaic_0001>
module attributes {stable_mosaic.version = 11 : i64} {
  func.func @_conv_relu_pool_kernel(%arg0: i32, %arg1: memref<1x1408x16xbf16, #tpu.memory_space<vmem>>, %arg2: memref<16x128xbf16, #tpu.memory_space<vmem>>, %arg3: memref<1x128xf32, #tpu.memory_space<vmem>>, %arg4: memref<1x352x128xbf16, #tpu.memory_space<vmem>>) attributes {dimension_semantics = [#tpu.dimension_semantics<parallel>], iteration_bounds = array<i64: 1>, scalar_prefetch = 0 : i64, scratch_operands = 0 : i64, tpu.core_type = #tpu.core_type<tc>, window_params = [{transform_indices = @transform_0, window_bounds = array<i64: 1, 1408, 16>}, {pipeline_mode = #tpu.pipeline_mode<synchronous>, transform_indices = @transform_1, window_bounds = array<i64: 16, 128>}, {pipeline_mode = #tpu.pipeline_mode<synchronous>, transform_indices = @transform_2, window_bounds = array<i64: 1, 128>}, {transform_indices = @transform_3, window_bounds = array<i64: 1, 352, 128>}]} {
    %c0 = arith.constant 0 : index
    %c0_0 = arith.constant 0 : index
    %c0_1 = arith.constant 0 : index
    %0 = vector.load %arg1[%c0, %c0_0, %c0_1] : memref<1x1408x16xbf16, #tpu.memory_space<vmem>>, vector<1x1408x16xbf16>
    %1 = vector.shape_cast %0 : vector<1x1408x16xbf16> to vector<1408x16xbf16>
    %c0_2 = arith.constant 0 : index
    %c0_3 = arith.constant 0 : index
    %2 = vector.load %arg2[%c0_2, %c0_3] : memref<16x128xbf16, #tpu.memory_space<vmem>>, vector<16x128xbf16>
    %cst = arith.constant dense<0.000000e+00> : vector<1408x128xf32>
    %3 = tpu.matmul %1, %2, %cst {dimension_numbers = #tpu.dot_dimension_numbers<[1], [0], [0], [1], [0, 0, 1, 1], [], []>} : vector<1408x16xbf16>, vector<16x128xbf16>, vector<1408x128xf32> -> vector<1408x128xf32>
    %4 = vector.extract_strided_slice %3 {offsets = [0, 0], sizes = [352, 128], strides = [1, 1]} : vector<1408x128xf32> to vector<352x128xf32>
    %5 = vector.extract_strided_slice %3 {offsets = [352, 0], sizes = [352, 128], strides = [1, 1]} : vector<1408x128xf32> to vector<352x128xf32>
    %6 = arith.maximumf %4, %5 : vector<352x128xf32>
    %7 = vector.extract_strided_slice %3 {offsets = [704, 0], sizes = [352, 128], strides = [1, 1]} : vector<1408x128xf32> to vector<352x128xf32>
    %8 = vector.extract_strided_slice %3 {offsets = [1056, 0], sizes = [352, 128], strides = [1, 1]} : vector<1408x128xf32> to vector<352x128xf32>
    %9 = arith.maximumf %7, %8 : vector<352x128xf32>
    %10 = arith.maximumf %6, %9 : vector<352x128xf32>
    %c0_4 = arith.constant 0 : index
    %c0_5 = arith.constant 0 : index
    %11 = vector.load %arg3[%c0_4, %c0_5] : memref<1x128xf32, #tpu.memory_space<vmem>>, vector<1x128xf32>
    %12 = vector.broadcast %11 : vector<1x128xf32> to vector<352x128xf32>
    %13 = arith.addf %10, %12 : vector<352x128xf32>
    %cst_6 = arith.constant 0.000000e+00 : f32
    %14 = vector.broadcast %cst_6 : f32 to vector<352x128xf32>
    %15 = arith.maximumf %13, %14 : vector<352x128xf32>
    %16 = arith.truncf %15 : vector<352x128xf32> to vector<352x128xbf16>
    %c0_7 = arith.constant 0 : index
    %c0_8 = arith.constant 0 : index
    %c0_9 = arith.constant 0 : index
    %17 = vector.load %arg4[%c0_7, %c0_8, %c0_9] : memref<1x352x128xbf16, #tpu.memory_space<vmem>>, vector<1x352x128xbf16>
    %18 = vector.shape_cast %17 : vector<1x352x128xbf16> to vector<352x128xbf16>
    %19 = vector.shape_cast %16 : vector<352x128xbf16> to vector<1x352x128xbf16>
    tpu.vector_store %arg4[%c0_7, %c0_8, %c0_9], %19 {strides = array<i32>} : memref<1x352x128xbf16, #tpu.memory_space<vmem>>, vector<1x352x128xbf16>,
    return
  }
  func.func @transform_0(%arg0: i32) -> (i32, i32, i32) {
    %c0_i32 = arith.constant 0 : i32
    %c0_i32_0 = arith.constant 0 : i32
    %c0_i32_1 = arith.constant 0 : i32
    return %arg0, %c0_i32, %c0_i32_0 : i32, i32, i32
  }
  func.func @transform_1(%arg0: i32) -> (i32, i32) {
    %c0_i32 = arith.constant 0 : i32
    %c0_i32_0 = arith.constant 0 : i32
    %c0_i32_1 = arith.constant 0 : i32
    return %c0_i32, %c0_i32_0 : i32, i32
  }
  func.func @transform_2(%arg0: i32) -> (i32, i32) {
    %c0_i32 = arith.constant 0 : i32
    %c0_i32_0 = arith.constant 0 : i32
    %c0_i32_1 = arith.constant 0 : i32
    return %c0_i32, %c0_i32_0 : i32, i32
  }
  func.func @transform_3(%arg0: i32) -> (i32, i32, i32) {
    %c0_i32 = arith.constant 0 : i32
    %c0_i32_0 = arith.constant 0 : i32
    %c0_i32_1 = arith.constant 0 : i32
    return %arg0, %c0_i32, %c0_i32_0 : i32, i32, i32
  }
}

module attributes {stable_mosaic.version = 11 : i64} {
  func.func @_conv_relu_pool_kernel(%arg0: i32, %arg1: memref<1x256x128xbf16, #tpu.memory_space<vmem>>, %arg2: memref<128x128xbf16, #tpu.memory_space<vmem>>, %arg3: memref<1x128xf32, #tpu.memory_space<vmem>>, %arg4: memref<1x64x128xbf16, #tpu.memory_space<vmem>>) attributes {dimension_semantics = [#tpu.dimension_semantics<parallel>], iteration_bounds = array<i64: 1>, scalar_prefetch = 0 : i64, scratch_operands = 0 : i64, tpu.core_type = #tpu.core_type<tc>, window_params = [{transform_indices = @transform_0, window_bounds = array<i64: 1, 256, 128>}, {pipeline_mode = #tpu.pipeline_mode<synchronous>, transform_indices = @transform_1, window_bounds = array<i64: 128, 128>}, {pipeline_mode = #tpu.pipeline_mode<synchronous>, transform_indices = @transform_2, window_bounds = array<i64: 1, 128>}, {transform_indices = @transform_3, window_bounds = array<i64: 1, 64, 128>}]} {
    %c0 = arith.constant 0 : index
    %c0_0 = arith.constant 0 : index
    %c0_1 = arith.constant 0 : index
    %0 = vector.load %arg1[%c0, %c0_0, %c0_1] : memref<1x256x128xbf16, #tpu.memory_space<vmem>>, vector<1x256x128xbf16>
    %1 = vector.shape_cast %0 : vector<1x256x128xbf16> to vector<256x128xbf16>
    %c0_2 = arith.constant 0 : index
    %c0_3 = arith.constant 0 : index
    %2 = vector.load %arg2[%c0_2, %c0_3] : memref<128x128xbf16, #tpu.memory_space<vmem>>, vector<128x128xbf16>
    %cst = arith.constant dense<0.000000e+00> : vector<256x128xf32>
    %3 = tpu.matmul %1, %2, %cst {dimension_numbers = #tpu.dot_dimension_numbers<[1], [0], [0], [1], [0, 0, 1, 1], [], []>} : vector<256x128xbf16>, vector<128x128xbf16>, vector<256x128xf32> -> vector<256x128xf32>
    %4 = vector.extract_strided_slice %3 {offsets = [0, 0], sizes = [64, 128], strides = [1, 1]} : vector<256x128xf32> to vector<64x128xf32>
    %5 = vector.extract_strided_slice %3 {offsets = [64, 0], sizes = [64, 128], strides = [1, 1]} : vector<256x128xf32> to vector<64x128xf32>
    %6 = arith.maximumf %4, %5 : vector<64x128xf32>
    %7 = vector.extract_strided_slice %3 {offsets = [128, 0], sizes = [64, 128], strides = [1, 1]} : vector<256x128xf32> to vector<64x128xf32>
    %8 = vector.extract_strided_slice %3 {offsets = [192, 0], sizes = [64, 128], strides = [1, 1]} : vector<256x128xf32> to vector<64x128xf32>
    %9 = arith.maximumf %7, %8 : vector<64x128xf32>
    %10 = arith.maximumf %6, %9 : vector<64x128xf32>
    %c0_4 = arith.constant 0 : index
    %c0_5 = arith.constant 0 : index
    %11 = vector.load %arg3[%c0_4, %c0_5] : memref<1x128xf32, #tpu.memory_space<vmem>>, vector<1x128xf32>
    %12 = vector.broadcast %11 : vector<1x128xf32> to vector<64x128xf32>
    %13 = arith.addf %10, %12 : vector<64x128xf32>
    %cst_6 = arith.constant 0.000000e+00 : f32
    %14 = vector.broadcast %cst_6 : f32 to vector<64x128xf32>
    %15 = arith.maximumf %13, %14 : vector<64x128xf32>
    %16 = arith.truncf %15 : vector<64x128xf32> to vector<64x128xbf16>
    %c0_7 = arith.constant 0 : index
    %c0_8 = arith.constant 0 : index
    %c0_9 = arith.constant 0 : index
    %17 = vector.load %arg4[%c0_7, %c0_8, %c0_9] : memref<1x64x128xbf16, #tpu.memory_space<vmem>>, vector<1x64x128xbf16>
    %18 = vector.shape_cast %17 : vector<1x64x128xbf16> to vector<64x128xbf16>
    %19 = vector.shape_cast %16 : vector<64x128xbf16> to vector<1x64x128xbf16>
    tpu.vector_store %arg4[%c0_7, %c0_8, %c0_9], %19 {strides = array<i32>} : memref<1x64x128xbf16, #tpu.memory_space<vmem>>, vector<1x64x128xbf16>,
    return
  }
  func.func @transform_0(%arg0: i32) -> (i32, i32, i32) {
    %c0_i32 = arith.constant 0 : i32
    %c0_i32_0 = arith.constant 0 : i32
    %c0_i32_1 = arith.constant 0 : i32
    return %arg0, %c0_i32, %c0_i32_0 : i32, i32, i32
  }
  func.func @transform_1(%arg0: i32) -> (i32, i32) {
    %c0_i32 = arith.constant 0 : i32
    %c0_i32_0 = arith.constant 0 : i32
    %c0_i32_1 = arith.constant 0 : i32
    return %c0_i32, %c0_i32_0 : i32, i32
  }
  func.func @transform_2(%arg0: i32) -> (i32, i32) {
    %c0_i32 = arith.constant 0 : i32
    %c0_i32_0 = arith.constant 0 : i32
    %c0_i32_1 = arith.constant 0 : i32
    return %c0_i32, %c0_i32_0 : i32, i32
  }
  func.func @transform_3(%arg0: i32) -> (i32, i32, i32) {
    %c0_i32 = arith.constant 0 : i32
    %c0_i32_0 = arith.constant 0 : i32
    %c0_i32_1 = arith.constant 0 : i32
    return %arg0, %c0_i32, %c0_i32_0 : i32, i32, i32
  }
}

module attributes {stable_mosaic.version = 11 : i64} {
  func.func @_fc_stack_kernel(%arg0: memref<8x512xbf16, #tpu.memory_space<vmem>>, %arg1: memref<512x128xbf16, #tpu.memory_space<vmem>>, %arg2: memref<1x128xf32, #tpu.memory_space<vmem>>, %arg3: memref<128x128xbf16, #tpu.memory_space<vmem>>, %arg4: memref<1x128xf32, #tpu.memory_space<vmem>>, %arg5: memref<128x128xbf16, #tpu.memory_space<vmem>>, %arg6: memref<1x128xf32, #tpu.memory_space<vmem>>, %arg7: memref<8x128xf32, #tpu.memory_space<vmem>>) attributes {dimension_semantics = [], scalar_prefetch = 0 : i64, scratch_operands = 0 : i64, tpu.core_type = #tpu.core_type<tc>} {
    %c0 = arith.constant 0 : index
    %c0_0 = arith.constant 0 : index
    %0 = vector.load %arg0[%c0, %c0_0] : memref<8x512xbf16, #tpu.memory_space<vmem>>, vector<8x512xbf16>
    %c0_1 = arith.constant 0 : index
    %c0_2 = arith.constant 0 : index
    %1 = vector.load %arg1[%c0_1, %c0_2] : memref<512x128xbf16, #tpu.memory_space<vmem>>, vector<512x128xbf16>
    %cst = arith.constant dense<0.000000e+00> : vector<8x128xf32>
    %2 = tpu.matmul %0, %1, %cst {dimension_numbers = #tpu.dot_dimension_numbers<[1], [0], [0], [1], [0, 0, 1, 1], [], []>} : vector<8x512xbf16>, vector<512x128xbf16>, vector<8x128xf32> -> vector<8x128xf32>
    %c0_3 = arith.constant 0 : index
    %c0_4 = arith.constant 0 : index
    %3 = vector.load %arg2[%c0_3, %c0_4] : memref<1x128xf32, #tpu.memory_space<vmem>>, vector<1x128xf32>
    %4 = vector.broadcast %3 : vector<1x128xf32> to vector<8x128xf32>
    %5 = arith.addf %2, %4 : vector<8x128xf32>
    %cst_5 = arith.constant 0.000000e+00 : f32
    %6 = vector.broadcast %cst_5 : f32 to vector<8x128xf32>
    %7 = arith.maximumf %5, %6 : vector<8x128xf32>
    %8 = arith.truncf %7 : vector<8x128xf32> to vector<8x128xbf16>
    %c0_6 = arith.constant 0 : index
    %c0_7 = arith.constant 0 : index
    %9 = vector.load %arg3[%c0_6, %c0_7] : memref<128x128xbf16, #tpu.memory_space<vmem>>, vector<128x128xbf16>
    %cst_8 = arith.constant dense<0.000000e+00> : vector<8x128xf32>
    %10 = tpu.matmul %8, %9, %cst_8 {dimension_numbers = #tpu.dot_dimension_numbers<[1], [0], [0], [1], [0, 0, 1, 1], [], []>} : vector<8x128xbf16>, vector<128x128xbf16>, vector<8x128xf32> -> vector<8x128xf32>
    %c0_9 = arith.constant 0 : index
    %c0_10 = arith.constant 0 : index
    %11 = vector.load %arg4[%c0_9, %c0_10] : memref<1x128xf32, #tpu.memory_space<vmem>>, vector<1x128xf32>
    %12 = vector.broadcast %11 : vector<1x128xf32> to vector<8x128xf32>
    %13 = arith.addf %10, %12 : vector<8x128xf32>
    %cst_11 = arith.constant 0.000000e+00 : f32
    %14 = vector.broadcast %cst_11 : f32 to vector<8x128xf32>
    %15 = arith.maximumf %13, %14 : vector<8x128xf32>
    %16 = arith.truncf %15 : vector<8x128xf32> to vector<8x128xbf16>
    %c0_12 = arith.constant 0 : index
    %c0_13 = arith.constant 0 : index
    %17 = vector.load %arg5[%c0_12, %c0_13] : memref<128x128xbf16, #tpu.memory_space<vmem>>, vector<128x128xbf16>
    %cst_14 = arith.constant dense<0.000000e+00> : vector<8x128xf32>
    %18 = tpu.matmul %16, %17, %cst_14 {dimension_numbers = #tpu.dot_dimension_numbers<[1], [0], [0], [1], [0, 0, 1, 1], [], []>} : vector<8x128xbf16>, vector<128x128xbf16>, vector<8x128xf32> -> vector<8x128xf32>
    %c0_15 = arith.constant 0 : index
    %c0_16 = arith.constant 0 : index
    %19 = vector.load %arg6[%c0_15, %c0_16] : memref<1x128xf32, #tpu.memory_space<vmem>>, vector<1x128xf32>
    %20 = vector.broadcast %19 : vector<1x128xf32> to vector<8x128xf32>
    %21 = arith.addf %18, %20 : vector<8x128xf32>
    %c0_17 = arith.constant 0 : index
    %c0_18 = arith.constant 0 : index
    %22 = vector.load %arg7[%c0_17, %c0_18] : memref<8x128xf32, #tpu.memory_space<vmem>>, vector<8x128xf32>
    tpu.vector_store %arg7[%c0_17, %c0_18], %21 {strides = array<i32>} : memref<8x128xf32, #tpu.memory_space<vmem>>, vector<8x128xf32>,
    return
  }
}

</mosaic_0001>

<bundles_post_ra>
// kernel: lenet_pallas.3
= control target key start
LH: loop header
LB: loop body
LE: loop exit
PB: predicated region body
PF: predicated region fallthrough
CT: control target
= control target key end

     0   :  { %vm639_vm0 = vcmask 130048   ;;  %s2828_s1 = inlined_call_operand.vmem [shape: bf16[16,128], index: 1, kind: input, shape index: {}]   ;;  %s2829_s0 = inlined_call_operand.vmem [shape: bf16[1,1408,16], index: 0, kind: input, shape index: {}]   ;;  %s2830_s2 = inlined_call_operand.vmem [shape: f32[1,128], index: 2, kind: input, shape index: {}]   ;;  %s2831_s3 = inlined_call_operand.vmem [shape: bf16[1,352,128], index: 3, kind: output, shape index: {}]  }
   0x1   :  { %v2201_v0 = vld [vmem:[%s2828_s1] sm:$0xff]  ;;  %v2135_v2 = vld [vmem:[%s2829_s0 + $0xb0] sm:$0xff]  ;;  %v2114_v5 = vld [vmem:[%s2829_s0 + $0x8] sm:$0xff] }
   0x2   :  { %v2113_v1 = vld [vmem:[%s2829_s0] sm:$0xff]  ;;  %911 = vmatpush.bf16.msra.mxu0 %v2201_v0  ;;  %2333 = vmatpush.bf16.msra.mxu1 %v2201_v0  ;;  %v2179_v4 = vld [vmem:[%s2829_s0 + $0x210] sm:$0xff]  ;;  %v2136_v6 = vld [vmem:[%s2829_s0 + $0xb8] sm:$0xff] }
   0x3   :  { %v2157_v3 = vld [vmem:[%s2829_s0 + $0x160] sm:$0xff]  ;;  %2334 = vmatpush.bf16.msra.mxu2 %v2201_v0  ;;  %2335 = vmatpush.bf16.msra.mxu3 %v2201_v0  ;;  %v2158_v7 = vld [vmem:[%s2829_s0 + $0x168] sm:$0xff]  ;;  %v2180_v8 = vld [vmem:[%s2829_s0 + $0x218] sm:$0xff] }
   0x4   :  { %v2115_v9 = vld [vmem:[%s2829_s0 + $0x10] sm:$0xff]  ;;  %v2137_v10 = vld [vmem:[%s2829_s0 + $0xc0] sm:$0xff]  ;;  %v2116_v13 = vld [vmem:[%s2829_s0 + $0x18] sm:$0xff] }
   0x5   :  { %2025 = vmatmul.msk.bf16.vlgmr.msra.gmra.mxu0 %vm639_vm0, %v2113_v1  ;;  %2047 = vmatmul.msk.bf16.vlgmr.msra.gmra.mxu1 %vm639_vm0, %v2135_v2  ;;  %v2159_v11 = vld [vmem:[%s2829_s0 + $0x170] sm:$0xff]  ;;  %v2181_v12 = vld [vmem:[%s2829_s0 + $0x220] sm:$0xff]  ;;  %v2138_v14 = vld [vmem:[%s2829_s0 + $0xc8] sm:$0xff] }
   0x6   :  { %2069 = vmatmul.msk.bf16.vlgmr.msra.gmra.mxu2 %vm639_vm0, %v2157_v3  ;;  %2091 = vmatmul.msk.bf16.vlgmr.msra.gmra.mxu3 %vm639_vm0, %v2179_v4  ;;  %v2160_v15 = vld [vmem:[%s2829_s0 + $0x178] sm:$0xff]  ;;  %v2182_v16 = vld [vmem:[%s2829_s0 + $0x228] sm:$0xff]  ;;  %v2117_v17 = vld [vmem:[%s2829_s0 + $0x20] sm:$0xff] }
   0x7   :  { %v2139_v18 = vld [vmem:[%s2829_s0 + $0xd0] sm:$0xff]  ;;  %v2161_v19 = vld [vmem:[%s2829_s0 + $0x180] sm:$0xff]  ;;  %v2118_v21 = vld [vmem:[%s2829_s0 + $0x28] sm:$0xff] }
   0x8   :  { %v2183_v20 = vld [vmem:[%s2829_s0 + $0x230] sm:$0xff]  ;;  %v2140_v22 = vld [vmem:[%s2829_s0 + $0xd8] sm:$0xff]  ;;  %v2162_v23 = vld [vmem:[%s2829_s0 + $0x188] sm:$0xff] }
   0x9   :  { %v2184_v24 = vld [vmem:[%s2829_s0 + $0x238] sm:$0xff]  ;;  %v2119_v25 = vld [vmem:[%s2829_s0 + $0x30] sm:$0xff]  ;;  %v2141_v26 = vld [vmem:[%s2829_s0 + $0xe0] sm:$0xff] }
   0xa   :  { %v2163_v27 = vld [vmem:[%s2829_s0 + $0x190] sm:$0xff]  ;;  %v2185_v28 = vld [vmem:[%s2829_s0 + $0x240] sm:$0xff]  ;;  %v2120_v29 = vld [vmem:[%s2829_s0 + $0x38] sm:$0xff] }
   0xb   :  { %v2142_v30 = vld [vmem:[%s2829_s0 + $0xe8] sm:$0xff]  ;;  %v2164_v31 = vld [vmem:[%s2829_s0 + $0x198] sm:$0xff]  ;;  %v2121_v33 = vld [vmem:[%s2829_s0 + $0x40] sm:$0xff] }
   0xc   :  { %v2186_v32 = vld [vmem:[%s2829_s0 + $0x248] sm:$0xff]  ;;  %v2143_v34 = vld [vmem:[%s2829_s0 + $0xf0] sm:$0xff]  ;;  %v2165_v37 = vld [vmem:[%s2829_s0 + $0x1a0] sm:$0xff] }
   0xd   :  { %v2187_v38 = vld [vmem:[%s2829_s0 + $0x250] sm:$0xff]  ;;  %v2508_v46 = vld [vmem:[%s2830_s2] ss:$0 sm:$0xff]  ;;  %v2122_v49 = vld [vmem:[%s2829_s0 + $0x48] sm:$0xff] }
   0xe   :  { %v2144_v50 = vld [vmem:[%s2829_s0 + $0xf8] sm:$0xff]  ;;  %v2166_v55 = vld [vmem:[%s2829_s0 + $0x1a8] sm:$0xff] }
   0xf   :  { %v2188_v56 = vld [vmem:[%s2829_s0 + $0x258] sm:$0xff] }
  0x15   :  { %2026 = vmatmul.msk.bf16.gmra.mxu0 %vm639_vm0, %v2114_v5  ;;  %2048 = vmatmul.msk.bf16.gmra.mxu1 %vm639_vm0, %v2136_v6 }
  0x16   :  { %2070 = vmatmul.msk.bf16.gmra.mxu2 %vm639_vm0, %v2158_v7  ;;  %2092 = vmatmul.msk.bf16.gmra.mxu3 %vm639_vm0, %v2180_v8  ;;  %v2123_v8 = vld [vmem:[%s2829_s0 + $0x50] sm:$0xff] }
  0x25   :  { %2027 = vmatmul.msk.bf16.gmra.mxu0 %vm639_vm0, %v2115_v9  ;;  %2049 = vmatmul.msk.bf16.gmra.mxu1 %vm639_vm0, %v2137_v10  ;;  %v2145_v9 = vld [vmem:[%s2829_s0 + $0x100] sm:$0xff] }
  0x26   :  { %2071 = vmatmul.msk.bf16.gmra.mxu2 %vm639_vm0, %v2159_v11  ;;  %2093 = vmatmul.msk.bf16.gmra.mxu3 %vm639_vm0, %v2181_v12 }
  0x35   :  { %2028 = vmatmul.msk.bf16.gmra.mxu0 %vm639_vm0, %v2116_v13  ;;  %2050 = vmatmul.msk.bf16.gmra.mxu1 %vm639_vm0, %v2138_v14  ;;  %v2167_v14 = vld [vmem:[%s2829_s0 + $0x1b0] sm:$0xff] }
  0x36   :  { %2072 = vmatmul.msk.bf16.gmra.mxu2 %vm639_vm0, %v2160_v15  ;;  %2094 = vmatmul.msk.bf16.gmra.mxu3 %vm639_vm0, %v2182_v16  ;;  %v2189_v15 = vld [vmem:[%s2829_s0 + $0x260] sm:$0xff] }
  0x45   :  { %2029 = vmatmul.msk.bf16.gmra.mxu0 %vm639_vm0, %v2117_v17  ;;  %2051 = vmatmul.msk.bf16.gmra.mxu1 %vm639_vm0, %v2139_v18 }
  0x46   :  { %2073 = vmatmul.msk.bf16.gmra.mxu2 %vm639_vm0, %v2161_v19  ;;  %2095 = vmatmul.msk.bf16.gmra.mxu3 %vm639_vm0, %v2183_v20 }
  0x55   :  { %2030 = vmatmul.msk.bf16.gmra.mxu0 %vm639_vm0, %v2118_v21  ;;  %2052 = vmatmul.msk.bf16.gmra.mxu1 %vm639_vm0, %v2140_v22 }
  0x56   :  { %2074 = vmatmul.msk.bf16.gmra.mxu2 %vm639_vm0, %v2162_v23  ;;  %2096 = vmatmul.msk.bf16.gmra.mxu3 %vm639_vm0, %v2184_v24 }
  0x65   :  { %2031 = vmatmul.msk.bf16.gmra.mxu0 %vm639_vm0, %v2119_v25  ;;  %2053 = vmatmul.msk.bf16.gmra.mxu1 %vm639_vm0, %v2141_v26 }
  0x66   :  { %2075 = vmatmul.msk.bf16.gmra.mxu2 %vm639_vm0, %v2163_v27  ;;  %2097 = vmatmul.msk.bf16.gmra.mxu3 %vm639_vm0, %v2185_v28 }
  0x75   :  { %2032 = vmatmul.msk.bf16.gmra.mxu0 %vm639_vm0, %v2120_v29  ;;  %2054 = vmatmul.msk.bf16.gmra.mxu1 %vm639_vm0, %v2142_v30 }
  0x76   :  { %2076 = vmatmul.msk.bf16.gmra.mxu2 %vm639_vm0, %v2164_v31  ;;  %2098 = vmatmul.msk.bf16.gmra.mxu3 %vm639_vm0, %v2186_v32  ;;  %v2124_v31 = vld [vmem:[%s2829_s0 + $0x58] sm:$0xff]  ;;  %v2146_v32 = vld [vmem:[%s2829_s0 + $0x108] sm:$0xff] }
  0x82   :  { %v913_v35 = vpop.f32.mrf.mxu0  ;;  %v1023_v36 = vpop.f32.mrf.mxu1 }
  0x83   :  { %v1353_v43 = vmax.f32 %v913_v35, %v1023_v36 }
  0x85   :  { %2033 = vmatmul.msk.bf16.gmra.mxu0 %vm639_vm0, %v2121_v33  ;;  %2055 = vmatmul.msk.bf16.gmra.mxu1 %vm639_vm0, %v2143_v34 }
  0x86   :  { %2077 = vmatmul.msk.bf16.gmra.mxu2 %vm639_vm0, %v2165_v37  ;;  %2099 = vmatmul.msk.bf16.gmra.mxu3 %vm639_vm0, %v2187_v38  ;;  %v2168_v37 = vld [vmem:[%s2829_s0 + $0x1b8] sm:$0xff]  ;;  %v2190_v38 = vld [vmem:[%s2829_s0 + $0x268] sm:$0xff] }
  0x89   :  { %v1133_v39 = vpop.f32.mrf.mxu2  ;;  %v1243_v40 = vpop.f32.mrf.mxu3 }
  0x8a   :  { %v915_v41 = vpop.f32.mrf.mxu0  ;;  %v1025_v42 = vpop.f32.mrf.mxu1  ;;  %v1397_v44 = vmax.f32 %v1133_v39, %v1243_v40 }
  0x8b   :  { %v1354_v51 = vmax.f32 %v915_v41, %v1025_v42 }
  0x8c   :  { %v1441_v45 = vmax.f32 %v1353_v43, %v1397_v44 }
  0x8e   :  { %v1489_v57 = vadd.f32 %v2508_v46, %v1441_v45 }
  0x90   :  { %v1533_v60 = vmax.f32 %v1489_v57, 0.0 }
  0x91   :  { %v1135_v47 = vpop.f32.mrf.mxu2  ;;  %v1245_v48 = vpop.f32.mrf.mxu3 }
  0x92   :  { %v1398_v52 = vmax.f32 %v1135_v47, %v1245_v48  ;;  %v918_v53 = vpop.f32.mrf.mxu0  ;;  %v1028_v54 = vpop.f32.mrf.mxu1 }
  0x93   :  { %v1355_v3 = vmax.f32 %v918_v53, %v1028_v54 }
  0x94   :  { %v1442_v58 = vmax.f32 %v1354_v51, %v1398_v52 }
  0x95   :  { %2034 = vmatmul.msk.bf16.gmra.mxu0 %vm639_vm0, %v2122_v49  ;;  %2056 = vmatmul.msk.bf16.gmra.mxu1 %vm639_vm0, %v2144_v50 }
  0x96   :  { %v1490_v59 = vadd.f32 %v2508_v46, %v1442_v58  ;;  %2078 = vmatmul.msk.bf16.gmra.mxu2 %vm639_vm0, %v2166_v55  ;;  %2100 = vmatmul.msk.bf16.gmra.mxu3 %vm639_vm0, %v2188_v56  ;;  %v2125_v55 = vld [vmem:[%s2829_s0 + $0x60] sm:$0xff]  ;;  %v2147_v56 = vld [vmem:[%s2829_s0 + $0x110] sm:$0xff] }
  0x98   :  { %v1534_v61 = vmax.f32 %v1490_v59, 0.0 }
  0x99   :  { %v1138_v62 = vpop.f32.mrf.mxu2  ;;  %v1248_v63 = vpop.f32.mrf.mxu3 }
  0x9a   :  { %v2205_v0 = vpack.c.bf16 %v1534_v61, %v1533_v60  ;;  %v920_v1 = vpop.f32.mrf.mxu0  ;;  %v1030_v2 = vpop.f32.mrf.mxu1  ;;  %v1399_v4 = vmax.f32 %v1138_v62, %v1248_v63  ;;  %v2169_v61 = vld [vmem:[%s2829_s0 + $0x1c0] sm:$0xff]  ;;  %v2191_v62 = vld [vmem:[%s2829_s0 + $0x270] sm:$0xff] }
  0x9b   :  { %v1356_v10 = vmax.f32 %v920_v1, %v1030_v2 }
  0x9c   :  { %2206 = vst [vmem:[%s2831_s3] sm:$0xff] %v2205_v0   ;;  %v1443_v5 = vmax.f32 %v1355_v3, %v1399_v4 }
  0x9e   :  { %v1491_v16 = vadd.f32 %v2508_v46, %v1443_v5 }
  0xa0   :  { %v1535_v19 = vmax.f32 %v1491_v16, 0.0 }
  0xa1   :  { %v1140_v6 = vpop.f32.mrf.mxu2  ;;  %v1250_v7 = vpop.f32.mrf.mxu3 }
  0xa2   :  { %v1400_v11 = vmax.f32 %v1140_v6, %v1250_v7  ;;  %v923_v12 = vpop.f32.mrf.mxu0  ;;  %v1033_v13 = vpop.f32.mrf.mxu1 }
  0xa3   :  { %v1357_v26 = vmax.f32 %v923_v12, %v1033_v13 }
  0xa4   :  { %v1444_v17 = vmax.f32 %v1356_v10, %v1400_v11 }
  0xa5   :  { %2035 = vmatmul.msk.bf16.gmra.mxu0 %vm639_vm0, %v2123_v8  ;;  %2057 = vmatmul.msk.bf16.gmra.mxu1 %vm639_vm0, %v2145_v9 }
  0xa6   :  { %v1492_v18 = vadd.f32 %v2508_v46, %v1444_v17  ;;  %2079 = vmatmul.msk.bf16.gmra.mxu2 %vm639_vm0, %v2167_v14  ;;  %2101 = vmatmul.msk.bf16.gmra.mxu3 %vm639_vm0, %v2189_v15  ;;  %v2126_v14 = vld [vmem:[%s2829_s0 + $0x68] sm:$0xff]  ;;  %v2148_v15 = vld [vmem:[%s2829_s0 + $0x118] sm:$0xff] }
  0xa8   :  { %v1536_v20 = vmax.f32 %v1492_v18, 0.0 }
  0xa9   :  { %v1143_v21 = vpop.f32.mrf.mxu2  ;;  %v1253_v22 = vpop.f32.mrf.mxu3 }
  0xaa   :  { %v2210_v23 = vpack.c.bf16 %v1536_v20, %v1535_v19  ;;  %v925_v24 = vpop.f32.mrf.mxu0  ;;  %v1035_v25 = vpop.f32.mrf.mxu1  ;;  %v1401_v27 = vmax.f32 %v1143_v21, %v1253_v22  ;;  %v2170_v20 = vld [vmem:[%s2829_s0 + $0x1c8] sm:$0xff]  ;;  %v2192_v21 = vld [vmem:[%s2829_s0 + $0x278] sm:$0xff] }
  0xab   :  { %v1358_v33 = vmax.f32 %v925_v24, %v1035_v25 }
  0xac   :  { %2312 = vst [vmem:[%s2831_s3 + $0x8] sm:$0xff] %v2210_v23   ;;  %v1445_v28 = vmax.f32 %v1357_v26, %v1401_v27 }
  0xae   :  { %v1493_v39 = vadd.f32 %v2508_v46, %v1445_v28 }
  0xb0   :  { %v1537_v42 = vmax.f32 %v1493_v39, 0.0 }
  0xb1   :  { %v1145_v29 = vpop.f32.mrf.mxu2  ;;  %v1255_v30 = vpop.f32.mrf.mxu3 }
  0xb2   :  { %v1402_v34 = vmax.f32 %v1145_v29, %v1255_v30  ;;  %v928_v35 = vpop.f32.mrf.mxu0  ;;  %v1038_v36 = vpop.f32.mrf.mxu1 }
  0xb3   :  { %v1359_v50 = vmax.f32 %v928_v35, %v1038_v36 }
  0xb4   :  { %v1446_v40 = vmax.f32 %v1358_v33, %v1402_v34 }
  0xb5   :  { %2036 = vmatmul.msk.bf16.gmra.mxu0 %vm639_vm0, %v2124_v31  ;;  %2058 = vmatmul.msk.bf16.gmra.mxu1 %vm639_vm0, %v2146_v32 }
  0xb6   :  { %v1494_v41 = vadd.f32 %v2508_v46, %v1446_v40  ;;  %2080 = vmatmul.msk.bf16.gmra.mxu2 %vm639_vm0, %v2168_v37  ;;  %2102 = vmatmul.msk.bf16.gmra.mxu3 %vm639_vm0, %v2190_v38  ;;  %v2127_v37 = vld [vmem:[%s2829_s0 + $0x70] sm:$0xff]  ;;  %v2149_v38 = vld [vmem:[%s2829_s0 + $0x120] sm:$0xff] }
  0xb8   :  { %v1538_v43 = vmax.f32 %v1494_v41, 0.0 }
  0xb9   :  { %v1148_v44 = vpop.f32.mrf.mxu2  ;;  %v1258_v45 = vpop.f32.mrf.mxu3 }
  0xba   :  { %v2215_v47 = vpack.c.bf16 %v1538_v43, %v1537_v42  ;;  %v930_v48 = vpop.f32.mrf.mxu0  ;;  %v1040_v49 = vpop.f32.mrf.mxu1  ;;  %v1403_v51 = vmax.f32 %v1148_v44, %v1258_v45  ;;  %v2171_v43 = vld [vmem:[%s2829_s0 + $0x1d0] sm:$0xff]  ;;  %v2193_v44 = vld [vmem:[%s2829_s0 + $0x280] sm:$0xff] }
  0xbb   :  { %v1360_v57 = vmax.f32 %v930_v48, %v1040_v49 }
  0xbc   :  { %2313 = vst [vmem:[%s2831_s3 + $0x10] sm:$0xff] %v2215_v47   ;;  %v1447_v52 = vmax.f32 %v1359_v50, %v1403_v51 }
  0xbe   :  { %v1495_v63 = vadd.f32 %v2508_v46, %v1447_v52 }
  0xc0   :  { %v1539_v2 = vmax.f32 %v1495_v63, 0.0 }
  0xc1   :  { %v1150_v53 = vpop.f32.mrf.mxu2  ;;  %v1260_v54 = vpop.f32.mrf.mxu3 }
  0xc2   :  { %v1404_v58 = vmax.f32 %v1150_v53, %v1260_v54  ;;  %v933_v59 = vpop.f32.mrf.mxu0  ;;  %v1043_v60 = vpop.f32.mrf.mxu1 }
  0xc3   :  { %v1361_v9 = vmax.f32 %v933_v59, %v1043_v60 }
  0xc4   :  { %v1448_v0 = vmax.f32 %v1360_v57, %v1404_v58 }
  0xc5   :  { %2037 = vmatmul.msk.bf16.gmra.mxu0 %vm639_vm0, %v2125_v55  ;;  %2059 = vmatmul.msk.bf16.gmra.mxu1 %vm639_vm0, %v2147_v56 }
  0xc6   :  { %v1496_v1 = vadd.f32 %v2508_v46, %v1448_v0  ;;  %2081 = vmatmul.msk.bf16.gmra.mxu2 %vm639_vm0, %v2169_v61  ;;  %2103 = vmatmul.msk.bf16.gmra.mxu3 %vm639_vm0, %v2191_v62  ;;  %v2128_v61 = vld [vmem:[%s2829_s0 + $0x78] sm:$0xff]  ;;  %v2150_v62 = vld [vmem:[%s2829_s0 + $0x128] sm:$0xff] }
  0xc8   :  { %v1540_v3 = vmax.f32 %v1496_v1, 0.0 }
  0xc9   :  { %v1153_v4 = vpop.f32.mrf.mxu2  ;;  %v1263_v5 = vpop.f32.mrf.mxu3 }
  0xca   :  { %v2220_v6 = vpack.c.bf16 %v1540_v3, %v1539_v2  ;;  %v935_v7 = vpop.f32.mrf.mxu0  ;;  %v1045_v8 = vpop.f32.mrf.mxu1  ;;  %v1405_v10 = vmax.f32 %v1153_v4, %v1263_v5  ;;  %v2172_v3 = vld [vmem:[%s2829_s0 + $0x1d8] sm:$0xff]  ;;  %v2194_v4 = vld [vmem:[%s2829_s0 + $0x288] sm:$0xff] }
  0xcb   :  { %v1362_v16 = vmax.f32 %v935_v7, %v1045_v8 }
  0xcc   :  { %2314 = vst [vmem:[%s2831_s3 + $0x18] sm:$0xff] %v2220_v6   ;;  %v1449_v11 = vmax.f32 %v1361_v9, %v1405_v10 }
  0xce   :  { %v1497_v22 = vadd.f32 %v2508_v46, %v1449_v11 }
  0xd0   :  { %v1541_v25 = vmax.f32 %v1497_v22, 0.0 }
  0xd1   :  { %v1155_v12 = vpop.f32.mrf.mxu2  ;;  %v1265_v13 = vpop.f32.mrf.mxu3 }
  0xd2   :  { %v1406_v17 = vmax.f32 %v1155_v12, %v1265_v13  ;;  %v938_v18 = vpop.f32.mrf.mxu0  ;;  %v1048_v19 = vpop.f32.mrf.mxu1 }
  0xd3   :  { %v1363_v32 = vmax.f32 %v938_v18, %v1048_v19 }
  0xd4   :  { %v1450_v23 = vmax.f32 %v1362_v16, %v1406_v17 }
  0xd5   :  { %2038 = vmatmul.msk.bf16.gmra.mxu0 %vm639_vm0, %v2126_v14  ;;  %2060 = vmatmul.msk.bf16.gmra.mxu1 %vm639_vm0, %v2148_v15 }
  0xd6   :  { %v1498_v24 = vadd.f32 %v2508_v46, %v1450_v23  ;;  %2082 = vmatmul.msk.bf16.gmra.mxu2 %vm639_vm0, %v2170_v20  ;;  %2104 = vmatmul.msk.bf16.gmra.mxu3 %vm639_vm0, %v2192_v21  ;;  %v2129_v20 = vld [vmem:[%s2829_s0 + $0x80] sm:$0xff]  ;;  %v2151_v21 = vld [vmem:[%s2829_s0 + $0x130] sm:$0xff] }
  0xd8   :  { %v1542_v26 = vmax.f32 %v1498_v24, 0.0 }
  0xd9   :  { %v1158_v27 = vpop.f32.mrf.mxu2  ;;  %v1268_v28 = vpop.f32.mrf.mxu3 }
  0xda   :  { %v2225_v29 = vpack.c.bf16 %v1542_v26, %v1541_v25  ;;  %v940_v30 = vpop.f32.mrf.mxu0  ;;  %v1050_v31 = vpop.f32.mrf.mxu1  ;;  %v1407_v33 = vmax.f32 %v1158_v27, %v1268_v28  ;;  %v2173_v26 = vld [vmem:[%s2829_s0 + $0x1e0] sm:$0xff]  ;;  %v2195_v27 = vld [vmem:[%s2829_s0 + $0x290] sm:$0xff] }
  0xdb   :  { %v1364_v39 = vmax.f32 %v940_v30, %v1050_v31 }
  0xdc   :  { %2315 = vst [vmem:[%s2831_s3 + $0x20] sm:$0xff] %v2225_v29   ;;  %v1451_v34 = vmax.f32 %v1363_v32, %v1407_v33 }
  0xde   :  { %v1499_v45 = vadd.f32 %v2508_v46, %v1451_v34 }
  0xe0   :  { %v1543_v49 = vmax.f32 %v1499_v45, 0.0 }
  0xe1   :  { %v1160_v35 = vpop.f32.mrf.mxu2  ;;  %v1270_v36 = vpop.f32.mrf.mxu3 }
  0xe2   :  { %v1408_v40 = vmax.f32 %v1160_v35, %v1270_v36  ;;  %v943_v41 = vpop.f32.mrf.mxu0  ;;  %v1053_v42 = vpop.f32.mrf.mxu1 }
  0xe3   :  { %v1365_v56 = vmax.f32 %v943_v41, %v1053_v42 }
  0xe4   :  { %v1452_v47 = vmax.f32 %v1364_v39, %v1408_v40 }
  0xe5   :  { %2039 = vmatmul.msk.bf16.gmra.mxu0 %vm639_vm0, %v2127_v37  ;;  %2061 = vmatmul.msk.bf16.gmra.mxu1 %vm639_vm0, %v2149_v38 }
  0xe6   :  { %v1500_v48 = vadd.f32 %v2508_v46, %v1452_v47  ;;  %2083 = vmatmul.msk.bf16.gmra.mxu2 %vm639_vm0, %v2171_v43  ;;  %2105 = vmatmul.msk.bf16.gmra.mxu3 %vm639_vm0, %v2193_v44  ;;  %v2130_v43 = vld [vmem:[%s2829_s0 + $0x88] sm:$0xff]  ;;  %v2152_v44 = vld [vmem:[%s2829_s0 + $0x138] sm:$0xff] }
  0xe8   :  { %v1544_v50 = vmax.f32 %v1500_v48, 0.0 }
  0xe9   :  { %v1163_v51 = vpop.f32.mrf.mxu2  ;;  %v1273_v52 = vpop.f32.mrf.mxu3 }
  0xea   :  { %v2230_v53 = vpack.c.bf16 %v1544_v50, %v1543_v49  ;;  %v945_v54 = vpop.f32.mrf.mxu0  ;;  %v1055_v55 = vpop.f32.mrf.mxu1  ;;  %v1409_v57 = vmax.f32 %v1163_v51, %v1273_v52  ;;  %v2174_v50 = vld [vmem:[%s2829_s0 + $0x1e8] sm:$0xff]  ;;  %v2196_v51 = vld [vmem:[%s2829_s0 + $0x298] sm:$0xff] }
  0xeb   :  { %v1366_v63 = vmax.f32 %v945_v54, %v1055_v55 }
  0xec   :  { %2316 = vst [vmem:[%s2831_s3 + $0x28] sm:$0xff] %v2230_v53   ;;  %v1453_v58 = vmax.f32 %v1365_v56, %v1409_v57 }
  0xee   :  { %v1501_v5 = vadd.f32 %v2508_v46, %v1453_v58 }
  0xf0   :  { %v1545_v8 = vmax.f32 %v1501_v5, 0.0 }
  0xf1   :  { %v1165_v59 = vpop.f32.mrf.mxu2  ;;  %v1275_v60 = vpop.f32.mrf.mxu3 }
  0xf2   :  { %v1410_v0 = vmax.f32 %v1165_v59, %v1275_v60  ;;  %v948_v1 = vpop.f32.mrf.mxu0  ;;  %v1058_v2 = vpop.f32.mrf.mxu1 }
  0xf3   :  { %v1367_v15 = vmax.f32 %v948_v1, %v1058_v2 }
  0xf4   :  { %v1454_v6 = vmax.f32 %v1366_v63, %v1410_v0 }
  0xf5   :  { %2040 = vmatmul.msk.bf16.gmra.mxu0 %vm639_vm0, %v2128_v61  ;;  %2062 = vmatmul.msk.bf16.gmra.mxu1 %vm639_vm0, %v2150_v62 }
  0xf6   :  { %v1502_v7 = vadd.f32 %v2508_v46, %v1454_v6  ;;  %2084 = vmatmul.msk.bf16.gmra.mxu2 %vm639_vm0, %v2172_v3  ;;  %2106 = vmatmul.msk.bf16.gmra.mxu3 %vm639_vm0, %v2194_v4  ;;  %v2131_v3 = vld [vmem:[%s2829_s0 + $0x90] sm:$0xff]  ;;  %v2153_v4 = vld [vmem:[%s2829_s0 + $0x140] sm:$0xff] }
  0xf8   :  { %v1546_v9 = vmax.f32 %v1502_v7, 0.0 }
  0xf9   :  { %v1168_v10 = vpop.f32.mrf.mxu2  ;;  %v1278_v11 = vpop.f32.mrf.mxu3 }
  0xfa   :  { %v2235_v12 = vpack.c.bf16 %v1546_v9, %v1545_v8  ;;  %v950_v13 = vpop.f32.mrf.mxu0  ;;  %v1060_v14 = vpop.f32.mrf.mxu1  ;;  %v1411_v16 = vmax.f32 %v1168_v10, %v1278_v11  ;;  %v2175_v9 = vld [vmem:[%s2829_s0 + $0x1f0] sm:$0xff]  ;;  %v2197_v10 = vld [vmem:[%s2829_s0 + $0x2a0] sm:$0xff] }
  0xfb   :  { %v1368_v22 = vmax.f32 %v950_v13, %v1060_v14 }
  0xfc   :  { %2317 = vst [vmem:[%s2831_s3 + $0x30] sm:$0xff] %v2235_v12   ;;  %v1455_v17 = vmax.f32 %v1367_v15, %v1411_v16 }
  0xfe   :  { %v1503_v28 = vadd.f32 %v2508_v46, %v1455_v17 }
 0x100   :  { %v1547_v31 = vmax.f32 %v1503_v28, 0.0 }
 0x101   :  { %v1170_v18 = vpop.f32.mrf.mxu2  ;;  %v1280_v19 = vpop.f32.mrf.mxu3 }
 0x102   :  { %v1412_v23 = vmax.f32 %v1170_v18, %v1280_v19  ;;  %v953_v24 = vpop.f32.mrf.mxu0  ;;  %v1063_v25 = vpop.f32.mrf.mxu1 }
 0x103   :  { %v1369_v38 = vmax.f32 %v953_v24, %v1063_v25 }
 0x104   :  { %v1456_v29 = vmax.f32 %v1368_v22, %v1412_v23 }
 0x105   :  { %2041 = vmatmul.msk.bf16.gmra.mxu0 %vm639_vm0, %v2129_v20  ;;  %2063 = vmatmul.msk.bf16.gmra.mxu1 %vm639_vm0, %v2151_v21 }
 0x106   :  { %v1504_v30 = vadd.f32 %v2508_v46, %v1456_v29  ;;  %2085 = vmatmul.msk.bf16.gmra.mxu2 %vm639_vm0, %v2173_v26  ;;  %2107 = vmatmul.msk.bf16.gmra.mxu3 %vm639_vm0, %v2195_v27  ;;  %v2132_v26 = vld [vmem:[%s2829_s0 + $0x98] sm:$0xff]  ;;  %v2154_v27 = vld [vmem:[%s2829_s0 + $0x148] sm:$0xff] }
 0x108   :  { %v1548_v32 = vmax.f32 %v1504_v30, 0.0 }
 0x109   :  { %v1173_v33 = vpop.f32.mrf.mxu2  ;;  %v1283_v34 = vpop.f32.mrf.mxu3 }
 0x10a   :  { %v2240_v35 = vpack.c.bf16 %v1548_v32, %v1547_v31  ;;  %v955_v36 = vpop.f32.mrf.mxu0  ;;  %v1065_v37 = vpop.f32.mrf.mxu1  ;;  %v1413_v39 = vmax.f32 %v1173_v33, %v1283_v34  ;;  %v2176_v32 = vld [vmem:[%s2829_s0 + $0x1f8] sm:$0xff]  ;;  %v2198_v33 = vld [vmem:[%s2829_s0 + $0x2a8] sm:$0xff] }
 0x10b   :  { %v1370_v45 = vmax.f32 %v955_v36, %v1065_v37 }
 0x10c   :  { %2318 = vst [vmem:[%s2831_s3 + $0x38] sm:$0xff] %v2240_v35   ;;  %v1457_v40 = vmax.f32 %v1369_v38, %v1413_v39 }
 0x10e   :  { %v1505_v52 = vadd.f32 %v2508_v46, %v1457_v40 }
 0x110   :  { %v1549_v55 = vmax.f32 %v1505_v52, 0.0 }
 0x111   :  { %v1175_v41 = vpop.f32.mrf.mxu2  ;;  %v1285_v42 = vpop.f32.mrf.mxu3 }
 0x112   :  { %v1414_v47 = vmax.f32 %v1175_v41, %v1285_v42  ;;  %v958_v48 = vpop.f32.mrf.mxu0  ;;  %v1068_v49 = vpop.f32.mrf.mxu1 }
 0x113   :  { %v1371_v62 = vmax.f32 %v958_v48, %v1068_v49 }
 0x114   :  { %v1458_v53 = vmax.f32 %v1370_v45, %v1414_v47 }
 0x115   :  { %2042 = vmatmul.msk.bf16.gmra.mxu0 %vm639_vm0, %v2130_v43  ;;  %2064 = vmatmul.msk.bf16.gmra.mxu1 %vm639_vm0, %v2152_v44 }
 0x116   :  { %v1506_v54 = vadd.f32 %v2508_v46, %v1458_v53  ;;  %2086 = vmatmul.msk.bf16.gmra.mxu2 %vm639_vm0, %v2174_v50  ;;  %2108 = vmatmul.msk.bf16.gmra.mxu3 %vm639_vm0, %v2196_v51  ;;  %v2133_v50 = vld [vmem:[%s2829_s0 + $0xa0] sm:$0xff]  ;;  %v2155_v51 = vld [vmem:[%s2829_s0 + $0x150] sm:$0xff] }
 0x118   :  { %v1550_v56 = vmax.f32 %v1506_v54, 0.0 }
 0x119   :  { %v1178_v57 = vpop.f32.mrf.mxu2  ;;  %v1288_v58 = vpop.f32.mrf.mxu3 }
 0x11a   :  { %v2245_v59 = vpack.c.bf16 %v1550_v56, %v1549_v55  ;;  %v960_v60 = vpop.f32.mrf.mxu0  ;;  %v1070_v61 = vpop.f32.mrf.mxu1  ;;  %v1415_v63 = vmax.f32 %v1178_v57, %v1288_v58  ;;  %v2177_v56 = vld [vmem:[%s2829_s0 + $0x200] sm:$0xff]  ;;  %v2199_v57 = vld [vmem:[%s2829_s0 + $0x2b0] sm:$0xff] }
 0x11b   :  { %v1372_v5 = vmax.f32 %v960_v60, %v1070_v61 }
 0x11c   :  { %2319 = vst [vmem:[%s2831_s3 + $0x40] sm:$0xff] %v2245_v59   ;;  %v1459_v0 = vmax.f32 %v1371_v62, %v1415_v63 }
 0x11e   :  { %v1507_v11 = vadd.f32 %v2508_v46, %v1459_v0 }
 0x120   :  { %v1551_v14 = vmax.f32 %v1507_v11, 0.0 }
 0x121   :  { %v1180_v1 = vpop.f32.mrf.mxu2  ;;  %v1290_v2 = vpop.f32.mrf.mxu3 }
 0x122   :  { %v1416_v6 = vmax.f32 %v1180_v1, %v1290_v2  ;;  %v963_v7 = vpop.f32.mrf.mxu0  ;;  %v1073_v8 = vpop.f32.mrf.mxu1 }
 0x123   :  { %v1373_v21 = vmax.f32 %v963_v7, %v1073_v8 }
 0x124   :  { %v1460_v12 = vmax.f32 %v1372_v5, %v1416_v6 }
 0x125   :  { %2043 = vmatmul.msk.bf16.gmra.mxu0 %vm639_vm0, %v2131_v3  ;;  %2065 = vmatmul.msk.bf16.gmra.mxu1 %vm639_vm0, %v2153_v4 }
 0x126   :  { %v1508_v13 = vadd.f32 %v2508_v46, %v1460_v12  ;;  %2087 = vmatmul.msk.bf16.gmra.mxu2 %vm639_vm0, %v2175_v9  ;;  %2109 = vmatmul.msk.bf16.gmra.mxu3 %vm639_vm0, %v2197_v10  ;;  %v2134_v9 = vld [vmem:[%s2829_s0 + $0xa8] sm:$0xff]  ;;  %v2156_v10 = vld [vmem:[%s2829_s0 + $0x158] sm:$0xff] }
 0x128   :  { %v1552_v15 = vmax.f32 %v1508_v13, 0.0 }
 0x129   :  { %v1183_v16 = vpop.f32.mrf.mxu2  ;;  %v1293_v17 = vpop.f32.mrf.mxu3 }
 0x12a   :  { %v2250_v18 = vpack.c.bf16 %v1552_v15, %v1551_v14  ;;  %v965_v19 = vpop.f32.mrf.mxu0  ;;  %v1075_v20 = vpop.f32.mrf.mxu1  ;;  %v1417_v22 = vmax.f32 %v1183_v16, %v1293_v17  ;;  %v2178_v15 = vld [vmem:[%s2829_s0 + $0x208] sm:$0xff]  ;;  %v2200_v16 = vld [vmem:[%s2829_s0 + $0x2b8] sm:$0xff] }
 0x12b   :  { %v1374_v28 = vmax.f32 %v965_v19, %v1075_v20 }
 0x12c   :  { %2320 = vst [vmem:[%s2831_s3 + $0x48] sm:$0xff] %v2250_v18   ;;  %v1461_v23 = vmax.f32 %v1373_v21, %v1417_v22 }
 0x12e   :  { %v1509_v34 = vadd.f32 %v2508_v46, %v1461_v23 }
 0x130   :  { %v1553_v37 = vmax.f32 %v1509_v34, 0.0 }
 0x131   :  { %v1185_v24 = vpop.f32.mrf.mxu2  ;;  %v1295_v25 = vpop.f32.mrf.mxu3 }
 0x132   :  { %v1418_v29 = vmax.f32 %v1185_v24, %v1295_v25  ;;  %v968_v30 = vpop.f32.mrf.mxu0  ;;  %v1078_v31 = vpop.f32.mrf.mxu1 }
 0x133   :  { %v1375_v44 = vmax.f32 %v968_v30, %v1078_v31 }
 0x134   :  { %v1462_v35 = vmax.f32 %v1374_v28, %v1418_v29 }
 0x135   :  { %2044 = vmatmul.msk.bf16.gmra.mxu0 %vm639_vm0, %v2132_v26  ;;  %2066 = vmatmul.msk.bf16.gmra.mxu1 %vm639_vm0, %v2154_v27 }
 0x136   :  { %v1510_v36 = vadd.f32 %v2508_v46, %v1462_v35  ;;  %2088 = vmatmul.msk.bf16.gmra.mxu2 %vm639_vm0, %v2176_v32  ;;  %2110 = vmatmul.msk.bf16.gmra.mxu3 %vm639_vm0, %v2198_v33 }
 0x138   :  { %v1554_v38 = vmax.f32 %v1510_v36, 0.0 }
 0x139   :  { %v1188_v39 = vpop.f32.mrf.mxu2  ;;  %v1298_v40 = vpop.f32.mrf.mxu3 }
 0x13a   :  { %v2255_v41 = vpack.c.bf16 %v1554_v38, %v1553_v37  ;;  %v970_v42 = vpop.f32.mrf.mxu0  ;;  %v1080_v43 = vpop.f32.mrf.mxu1  ;;  %v1419_v45 = vmax.f32 %v1188_v39, %v1298_v40 }
 0x13b   :  { %v1376_v52 = vmax.f32 %v970_v42, %v1080_v43 }
 0x13c   :  { %2321 = vst [vmem:[%s2831_s3 + $0x50] sm:$0xff] %v2255_v41   ;;  %v1463_v47 = vmax.f32 %v1375_v44, %v1419_v45 }
 0x13e   :  { %v1511_v58 = vadd.f32 %v2508_v46, %v1463_v47 }
 0x140   :  { %v1555_v61 = vmax.f32 %v1511_v58, 0.0 }
 0x141   :  { %v1190_v48 = vpop.f32.mrf.mxu2  ;;  %v1300_v49 = vpop.f32.mrf.mxu3 }
 0x142   :  { %v1420_v53 = vmax.f32 %v1190_v48, %v1300_v49  ;;  %v973_v54 = vpop.f32.mrf.mxu0  ;;  %v1083_v55 = vpop.f32.mrf.mxu1 }
 0x143   :  { %v1377_v4 = vmax.f32 %v973_v54, %v1083_v55 }
 0x144   :  { %v1464_v59 = vmax.f32 %v1376_v52, %v1420_v53 }
 0x145   :  { %2045 = vmatmul.msk.bf16.gmra.mxu0 %vm639_vm0, %v2133_v50  ;;  %2067 = vmatmul.msk.bf16.gmra.mxu1 %vm639_vm0, %v2155_v51 }
 0x146   :  { %v1512_v60 = vadd.f32 %v2508_v46, %v1464_v59  ;;  %2089 = vmatmul.msk.bf16.gmra.mxu2 %vm639_vm0, %v2177_v56  ;;  %2111 = vmatmul.msk.bf16.gmra.mxu3 %vm639_vm0, %v2199_v57 }
 0x148   :  { %v1556_v62 = vmax.f32 %v1512_v60, 0.0 }
 0x149   :  { %v1193_v63 = vpop.f32.mrf.mxu2  ;;  %v1303_v0 = vpop.f32.mrf.mxu3 }
 0x14a   :  { %v2260_v1 = vpack.c.bf16 %v1556_v62, %v1555_v61  ;;  %v975_v2 = vpop.f32.mrf.mxu0  ;;  %v1085_v3 = vpop.f32.mrf.mxu1  ;;  %v1421_v5 = vmax.f32 %v1193_v63, %v1303_v0 }
 0x14b   :  { %v1378_v11 = vmax.f32 %v975_v2, %v1085_v3 }
 0x14c   :  { %2322 = vst [vmem:[%s2831_s3 + $0x58] sm:$0xff] %v2260_v1   ;;  %v1465_v6 = vmax.f32 %v1377_v4, %v1421_v5 }
 0x14e   :  { %v1513_v17 = vadd.f32 %v2508_v46, %v1465_v6 }
 0x150   :  { %v1557_v20 = vmax.f32 %v1513_v17, 0.0 }
 0x151   :  { %v1195_v7 = vpop.f32.mrf.mxu2  ;;  %v1305_v8 = vpop.f32.mrf.mxu3 }
 0x152   :  { %v1422_v12 = vmax.f32 %v1195_v7, %v1305_v8  ;;  %v978_v13 = vpop.f32.mrf.mxu0  ;;  %v1088_v14 = vpop.f32.mrf.mxu1 }
 0x153   :  { %v1379_v27 = vmax.f32 %v978_v13, %v1088_v14 }
 0x154   :  { %v1466_v18 = vmax.f32 %v1378_v11, %v1422_v12 }
 0x155   :  { %2046 = vmatmul.msk.bf16.gmra.mxu0 %vm639_vm0, %v2134_v9  ;;  %2068 = vmatmul.msk.bf16.gmra.mxu1 %vm639_vm0, %v2156_v10 }
 0x156   :  { %v1514_v19 = vadd.f32 %v2508_v46, %v1466_v18  ;;  %2090 = vmatmul.msk.bf16.gmra.mxu2 %vm639_vm0, %v2178_v15  ;;  %2112 = vmatmul.msk.bf16.gmra.mxu3 %vm639_vm0, %v2200_v16 }
 0x158   :  { %v1558_v21 = vmax.f32 %v1514_v19, 0.0 }
 0x159   :  { %v1198_v22 = vpop.f32.mrf.mxu2  ;;  %v1308_v23 = vpop.f32.mrf.mxu3 }
 0x15a   :  { %v2265_v24 = vpack.c.bf16 %v1558_v21, %v1557_v20  ;;  %v980_v25 = vpop.f32.mrf.mxu0  ;;  %v1090_v26 = vpop.f32.mrf.mxu1  ;;  %v1423_v28 = vmax.f32 %v1198_v22, %v1308_v23 }
 0x15b   :  { %v1380_v32 = vmax.f32 %v980_v25, %v1090_v26 }
 0x15c   :  { %2323 = vst [vmem:[%s2831_s3 + $0x60] sm:$0xff] %v2265_v24   ;;  %v1467_v29 = vmax.f32 %v1379_v27, %v1423_v28 }
 0x15e   :  { %v1515_v36 = vadd.f32 %v2508_v46, %v1467_v29 }
 0x160   :  { %v1559_v39 = vmax.f32 %v1515_v36, 0.0 }
 0x161   :  { %v1200_v30 = vpop.f32.mrf.mxu2  ;;  %v1310_v31 = vpop.f32.mrf.mxu3 }
 0x162   :  { %v1424_v33 = vmax.f32 %v1200_v30, %v1310_v31  ;;  %v983_v34 = vpop.f32.mrf.mxu0  ;;  %v1093_v35 = vpop.f32.mrf.mxu1 }
 0x163   :  { %v1381_v47 = vmax.f32 %v983_v34, %v1093_v35 }
 0x164   :  { %v1468_v37 = vmax.f32 %v1380_v32, %v1424_v33 }
 0x166   :  { %v1516_v38 = vadd.f32 %v2508_v46, %v1468_v37 }
 0x168   :  { %v1560_v40 = vmax.f32 %v1516_v38, 0.0 }
 0x169   :  { %v1203_v41 = vpop.f32.mrf.mxu2  ;;  %v1313_v42 = vpop.f32.mrf.mxu3 }
 0x16a   :  { %v2270_v43 = vpack.c.bf16 %v1560_v40, %v1559_v39  ;;  %v985_v44 = vpop.f32.mrf.mxu0  ;;  %v1095_v45 = vpop.f32.mrf.mxu1  ;;  %v1425_v48 = vmax.f32 %v1203_v41, %v1313_v42 }
 0x16b   :  { %v1382_v52 = vmax.f32 %v985_v44, %v1095_v45 }
 0x16c   :  { %2324 = vst [vmem:[%s2831_s3 + $0x68] sm:$0xff] %v2270_v43   ;;  %v1469_v49 = vmax.f32 %v1381_v47, %v1425_v48 }
 0x16e   :  { %v1517_v56 = vadd.f32 %v2508_v46, %v1469_v49 }
 0x170   :  { %v1561_v59 = vmax.f32 %v1517_v56, 0.0 }
 0x171   :  { %v1205_v50 = vpop.f32.mrf.mxu2  ;;  %v1315_v51 = vpop.f32.mrf.mxu3 }
 0x172   :  { %v1426_v53 = vmax.f32 %v1205_v50, %v1315_v51  ;;  %v988_v54 = vpop.f32.mrf.mxu0  ;;  %v1098_v55 = vpop.f32.mrf.mxu1 }
 0x173   :  { %v1383_v2 = vmax.f32 %v988_v54, %v1098_v55 }
 0x174   :  { %v1470_v57 = vmax.f32 %v1382_v52, %v1426_v53 }
 0x176   :  { %v1518_v58 = vadd.f32 %v2508_v46, %v1470_v57 }
 0x178   :  { %v1562_v60 = vmax.f32 %v1518_v58, 0.0 }
 0x179   :  { %v1208_v61 = vpop.f32.mrf.mxu2  ;;  %v1318_v62 = vpop.f32.mrf.mxu3 }
 0x17a   :  { %v2275_v63 = vpack.c.bf16 %v1562_v60, %v1561_v59  ;;  %v990_v0 = vpop.f32.mrf.mxu0  ;;  %v1100_v1 = vpop.f32.mrf.mxu1  ;;  %v1427_v3 = vmax.f32 %v1208_v61, %v1318_v62 }
 0x17b   :  { %v1384_v7 = vmax.f32 %v990_v0, %v1100_v1 }
 0x17c   :  { %2325 = vst [vmem:[%s2831_s3 + $0x70] sm:$0xff] %v2275_v63   ;;  %v1471_v4 = vmax.f32 %v1383_v2, %v1427_v3 }
 0x17e   :  { %v1519_v11 = vadd.f32 %v2508_v46, %v1471_v4 }
 0x180   :  { %v1563_v14 = vmax.f32 %v1519_v11, 0.0 }
 0x181   :  { %v1210_v5 = vpop.f32.mrf.mxu2  ;;  %v1320_v6 = vpop.f32.mrf.mxu3 }
 0x182   :  { %v1428_v8 = vmax.f32 %v1210_v5, %v1320_v6  ;;  %v993_v9 = vpop.f32.mrf.mxu0  ;;  %v1103_v10 = vpop.f32.mrf.mxu1 }
 0x183   :  { %v1385_v21 = vmax.f32 %v993_v9, %v1103_v10 }
 0x184   :  { %v1472_v12 = vmax.f32 %v1384_v7, %v1428_v8 }
 0x186   :  { %v1520_v13 = vadd.f32 %v2508_v46, %v1472_v12 }
 0x188   :  { %v1564_v15 = vmax.f32 %v1520_v13, 0.0 }
 0x189   :  { %v1213_v16 = vpop.f32.mrf.mxu2  ;;  %v1323_v17 = vpop.f32.mrf.mxu3 }
 0x18a   :  { %v2280_v18 = vpack.c.bf16 %v1564_v15, %v1563_v14  ;;  %v995_v19 = vpop.f32.mrf.mxu0  ;;  %v1105_v20 = vpop.f32.mrf.mxu1  ;;  %v1429_v22 = vmax.f32 %v1213_v16, %v1323_v17 }
 0x18b   :  { %v1386_v26 = vmax.f32 %v995_v19, %v1105_v20 }
 0x18c   :  { %2326 = vst [vmem:[%s2831_s3 + $0x78] sm:$0xff] %v2280_v18   ;;  %v1473_v23 = vmax.f32 %v1385_v21, %v1429_v22 }
 0x18e   :  { %v1521_v30 = vadd.f32 %v2508_v46, %v1473_v23 }
 0x190   :  { %v1565_v33 = vmax.f32 %v1521_v30, 0.0 }
 0x191   :  { %v1215_v24 = vpop.f32.mrf.mxu2  ;;  %v1325_v25 = vpop.f32.mrf.mxu3 }
 0x192   :  { %v1430_v27 = vmax.f32 %v1215_v24, %v1325_v25  ;;  %v998_v28 = vpop.f32.mrf.mxu0  ;;  %v1108_v29 = vpop.f32.mrf.mxu1 }
 0x193   :  { %v1387_v40 = vmax.f32 %v998_v28, %v1108_v29 }
 0x194   :  { %v1474_v31 = vmax.f32 %v1386_v26, %v1430_v27 }
 0x196   :  { %v1522_v32 = vadd.f32 %v2508_v46, %v1474_v31 }
 0x198   :  { %v1566_v34 = vmax.f32 %v1522_v32, 0.0 }
 0x199   :  { %v1218_v35 = vpop.f32.mrf.mxu2  ;;  %v1328_v36 = vpop.f32.mrf.mxu3 }
 0x19a   :  { %v2285_v37 = vpack.c.bf16 %v1566_v34, %v1565_v33  ;;  %v1000_v38 = vpop.f32.mrf.mxu0  ;;  %v1110_v39 = vpop.f32.mrf.mxu1  ;;  %v1431_v41 = vmax.f32 %v1218_v35, %v1328_v36 }
 0x19b   :  { %v1388_v45 = vmax.f32 %v1000_v38, %v1110_v39 }
 0x19c   :  { %2327 = vst [vmem:[%s2831_s3 + $0x80] sm:$0xff] %v2285_v37   ;;  %v1475_v42 = vmax.f32 %v1387_v40, %v1431_v41 }
 0x19e   :  { %v1523_v50 = vadd.f32 %v2508_v46, %v1475_v42 }
 0x1a0   :  { %v1567_v53 = vmax.f32 %v1523_v50, 0.0 }
 0x1a1   :  { %v1220_v43 = vpop.f32.mrf.mxu2  ;;  %v1330_v44 = vpop.f32.mrf.mxu3 }
 0x1a2   :  { %v1432_v47 = vmax.f32 %v1220_v43, %v1330_v44  ;;  %v1003_v48 = vpop.f32.mrf.mxu0  ;;  %v1113_v49 = vpop.f32.mrf.mxu1 }
 0x1a3   :  { %v1389_v60 = vmax.f32 %v1003_v48, %v1113_v49 }
 0x1a4   :  { %v1476_v51 = vmax.f32 %v1388_v45, %v1432_v47  ;;  %v2337_v45 = vld [vmem:[%s2830_s2] ss:$0 sm:$0xff] }
 0x1a6   :  { %v1524_v52 = vadd.f32 %v2508_v46, %v1476_v51 }
 0x1a8   :  { %v1568_v54 = vmax.f32 %v1524_v52, 0.0 }
 0x1a9   :  { %v1223_v55 = vpop.f32.mrf.mxu2  ;;  %v1333_v56 = vpop.f32.mrf.mxu3 }
 0x1aa   :  { %v2290_v57 = vpack.c.bf16 %v1568_v54, %v1567_v53  ;;  %v1005_v58 = vpop.f32.mrf.mxu0  ;;  %v1115_v59 = vpop.f32.mrf.mxu1  ;;  %v1433_v61 = vmax.f32 %v1223_v55, %v1333_v56 }
 0x1ab   :  { %v1390_v1 = vmax.f32 %v1005_v58, %v1115_v59 }
 0x1ac   :  { %2328 = vst [vmem:[%s2831_s3 + $0x88] sm:$0xff] %v2290_v57   ;;  %v1477_v62 = vmax.f32 %v1389_v60, %v1433_v61 }
 0x1ae   :  { %v1525_v5 = vadd.f32 %v2508_v46, %v1477_v62 }
 0x1b0   :  { %v1569_v8 = vmax.f32 %v1525_v5, 0.0 }
 0x1b1   :  { %v1225_v63 = vpop.f32.mrf.mxu2  ;;  %v1335_v0 = vpop.f32.mrf.mxu3 }
 0x1b2   :  { %v1434_v2 = vmax.f32 %v1225_v63, %v1335_v0  ;;  %v1008_v3 = vpop.f32.mrf.mxu0  ;;  %v1118_v4 = vpop.f32.mrf.mxu1 }
 0x1b3   :  { %v1391_v15 = vmax.f32 %v1008_v3, %v1118_v4 }
 0x1b4   :  { %v1478_v6 = vmax.f32 %v1390_v1, %v1434_v2 }
 0x1b6   :  { %v1526_v7 = vadd.f32 %v2508_v46, %v1478_v6 }
 0x1b8   :  { %v1570_v9 = vmax.f32 %v1526_v7, 0.0 }
 0x1b9   :  { %v1228_v10 = vpop.f32.mrf.mxu2  ;;  %v1338_v11 = vpop.f32.mrf.mxu3 }
 0x1ba   :  { %v2295_v12 = vpack.c.bf16 %v1570_v9, %v1569_v8  ;;  %v1010_v13 = vpop.f32.mrf.mxu0  ;;  %v1120_v14 = vpop.f32.mrf.mxu1  ;;  %v1435_v16 = vmax.f32 %v1228_v10, %v1338_v11 }
 0x1bb   :  { %v1392_v20 = vmax.f32 %v1010_v13, %v1120_v14 }
 0x1bc   :  { %2329 = vst [vmem:[%s2831_s3 + $0x90] sm:$0xff] %v2295_v12   ;;  %v1479_v17 = vmax.f32 %v1391_v15, %v1435_v16 }
 0x1be   :  { %v1527_v24 = vadd.f32 %v2508_v46, %v1479_v17 }
 0x1c0   :  { %v1571_v27 = vmax.f32 %v1527_v24, 0.0 }
 0x1c1   :  { %v1230_v18 = vpop.f32.mrf.mxu2  ;;  %v1340_v19 = vpop.f32.mrf.mxu3 }
 0x1c2   :  { %v1436_v21 = vmax.f32 %v1230_v18, %v1340_v19  ;;  %v1013_v22 = vpop.f32.mrf.mxu0  ;;  %v1123_v23 = vpop.f32.mrf.mxu1 }
 0x1c3   :  { %v1393_v34 = vmax.f32 %v1013_v22, %v1123_v23 }
 0x1c4   :  { %v1480_v25 = vmax.f32 %v1392_v20, %v1436_v21 }
 0x1c6   :  { %v1528_v26 = vadd.f32 %v2508_v46, %v1480_v25 }
 0x1c8   :  { %v1572_v28 = vmax.f32 %v1528_v26, 0.0 }
 0x1c9   :  { %v1233_v29 = vpop.f32.mrf.mxu2  ;;  %v1343_v30 = vpop.f32.mrf.mxu3 }
 0x1ca   :  { %v2300_v31 = vpack.c.bf16 %v1572_v28, %v1571_v27  ;;  %v1015_v32 = vpop.f32.mrf.mxu0  ;;  %v1125_v33 = vpop.f32.mrf.mxu1  ;;  %v1437_v35 = vmax.f32 %v1233_v29, %v1343_v30 }
 0x1cb   :  { %v1394_v39 = vmax.f32 %v1015_v32, %v1125_v33 }
 0x1cc   :  { %2330 = vst [vmem:[%s2831_s3 + $0x98] sm:$0xff] %v2300_v31   ;;  %v1481_v36 = vmax.f32 %v1393_v34, %v1437_v35 }
 0x1ce   :  { %v1529_v41 = vadd.f32 %v2508_v46, %v1481_v36 }
 0x1d0   :  { %v1573_v48 = vmax.f32 %v1529_v41, 0.0 }
 0x1d1   :  { %v1235_v37 = vpop.f32.mrf.mxu2  ;;  %v1345_v38 = vpop.f32.mrf.mxu3 }
 0x1d2   :  { %v1438_v40 = vmax.f32 %v1235_v37, %v1345_v38  ;;  %v1018_v43 = vpop.f32.mrf.mxu0  ;;  %v1128_v44 = vpop.f32.mrf.mxu1 }
 0x1d3   :  { %v1395_v53 = vmax.f32 %v1018_v43, %v1128_v44 }
 0x1d4   :  { %v1482_v42 = vmax.f32 %v1394_v39, %v1438_v40 }
 0x1d6   :  { %v1530_v47 = vadd.f32 %v2337_v45, %v1482_v42 }
 0x1d8   :  { %v1574_v49 = vmax.f32 %v1530_v47, 0.0 }
 0x1d9   :  { %v1238_v50 = vpop.f32.mrf.mxu2  ;;  %v1348_v51 = vpop.f32.mrf.mxu3 }
 0x1da   :  { %v2305_v52 = vpack.c.bf16 %v1574_v49, %v1573_v48  ;;  %v1439_v54 = vmax.f32 %v1238_v50, %v1348_v51  ;;  %v1020_v46 = vpop.f32.mrf.mxu0  ;;  %v1130_v55 = vpop.f32.mrf.mxu1 }
 0x1db   :  { %v1396_v59 = vmax.f32 %v1020_v46, %v1130_v55 }
 0x1dc   :  { %2331 = vst [vmem:[%s2831_s3 + $0xa0] sm:$0xff] %v2305_v52   ;;  %v1483_v56 = vmax.f32 %v1395_v53, %v1439_v54 }
 0x1de   :  { %v1531_v61 = vadd.f32 %v2337_v45, %v1483_v56 }
 0x1e0   :  { %v1575_v0 = vmax.f32 %v1531_v61, 0.0 }
 0x1e1   :  { %v1240_v57 = vpop.f32.mrf.mxu2  ;;  %v1350_v58 = vpop.f32.mrf.mxu3 }
 0x1e2   :  { %v1440_v60 = vmax.f32 %v1240_v57, %v1350_v58 }
 0x1e4   :  { %v1484_v62 = vmax.f32 %v1396_v59, %v1440_v60 }
 0x1e6   :  { %v1532_v63 = vadd.f32 %v2337_v45, %v1484_v62 }
 0x1e8   :  { %v1576_v1 = vmax.f32 %v1532_v63, 0.0 }
 0x1ea   :  { %v2310_v2 = vpack.c.bf16 %v1576_v1, %v1575_v0 }
 0x1ec   :  { %2332 = vst [vmem:[%s2831_s3 + $0xa8] sm:$0xff] %v2310_v2  }

// kernel: lenet_pallas.4
= control target key start
LH: loop header
LB: loop body
LE: loop exit
PB: predicated region body
PF: predicated region fallthrough
CT: control target
= control target key end

     0   :  { %s644_s1 = inlined_call_operand.vmem [shape: bf16[128,128], index: 1, kind: input, shape index: {}]   ;;  %s645_s0 = inlined_call_operand.vmem [shape: bf16[1,256,128], index: 0, kind: input, shape index: {}]   ;;  %s646_s2 = inlined_call_operand.vmem [shape: f32[1,128], index: 2, kind: input, shape index: {}]   ;;  %s647_s3 = inlined_call_operand.vmem [shape: bf16[1,64,128], index: 3, kind: output, shape index: {}]  }
   0x1   :  { %v478_v0 = vld [vmem:[%s644_s1 + $0x38] sm:$0xff]  ;;  %v477_v1 = vld [vmem:[%s644_s1 + $0x30] sm:$0xff]  ;;  %v476_v2 = vld [vmem:[%s644_s1 + $0x28] sm:$0xff] }
   0x2   :  { %206 = vmatpush.bf16.msra.mxu0 %v478_v0  ;;  %502 = vmatpush.bf16.msra.mxu1 %v478_v0  ;;  %v475_v3 = vld [vmem:[%s644_s1 + $0x20] sm:$0xff]  ;;  %v474_v4 = vld [vmem:[%s644_s1 + $0x18] sm:$0xff]  ;;  %v473_v5 = vld [vmem:[%s644_s1 + $0x10] sm:$0xff] }
   0x3   :  { %503 = vmatpush.bf16.msra.mxu2 %v478_v0  ;;  %504 = vmatpush.bf16.msra.mxu3 %v478_v0  ;;  %v472_v6 = vld [vmem:[%s644_s1 + $0x8] sm:$0xff]  ;;  %v471_v7 = vld [vmem:[%s644_s1] sm:$0xff]  ;;  %v457_v16 = vld [vmem:[%s645_s0 + $0x10] sm:$0xff] }
   0x4   :  { %v455_v8 = vld [vmem:[%s645_s0] sm:$0xff]  ;;  %v456_v12 = vld [vmem:[%s645_s0 + $0x8] sm:$0xff]  ;;  %v461_v17 = vld [vmem:[%s645_s0 + $0x30] sm:$0xff] }
   0x5   :  { %v459_v9 = vld [vmem:[%s645_s0 + $0x20] sm:$0xff]  ;;  %v460_v13 = vld [vmem:[%s645_s0 + $0x28] sm:$0xff]  ;;  %v465_v18 = vld [vmem:[%s645_s0 + $0x50] sm:$0xff] }
   0x6   :  { %207 = vmatpush.bf16.msra.mxu0 %v477_v1  ;;  %505 = vmatpush.bf16.msra.mxu1 %v477_v1  ;;  %v463_v10 = vld [vmem:[%s645_s0 + $0x40] sm:$0xff]  ;;  %v464_v14 = vld [vmem:[%s645_s0 + $0x48] sm:$0xff]  ;;  %v469_v19 = vld [vmem:[%s645_s0 + $0x70] sm:$0xff] }
   0x7   :  { %506 = vmatpush.bf16.msra.mxu2 %v477_v1  ;;  %507 = vmatpush.bf16.msra.mxu3 %v477_v1  ;;  %v467_v11 = vld [vmem:[%s645_s0 + $0x60] sm:$0xff]  ;;  %v468_v15 = vld [vmem:[%s645_s0 + $0x68] sm:$0xff]  ;;  %v458_v20 = vld [vmem:[%s645_s0 + $0x18] sm:$0xff] }
   0x8   :  { %v462_v21 = vld [vmem:[%s645_s0 + $0x38] sm:$0xff]  ;;  %v622_v33 = vld [vmem:[%s646_s2] ss:$0 sm:$0xff] }
   0x9   :  { %v466_v22 = vld [vmem:[%s645_s0 + $0x58] sm:$0xff] }
   0xa   :  { %208 = vmatpush.bf16.msra.mxu0 %v476_v2  ;;  %508 = vmatpush.bf16.msra.mxu1 %v476_v2  ;;  %v470_v23 = vld [vmem:[%s645_s0 + $0x78] sm:$0xff] }
   0xb   :  { %509 = vmatpush.bf16.msra.mxu2 %v476_v2  ;;  %510 = vmatpush.bf16.msra.mxu3 %v476_v2 }
   0xe   :  { %209 = vmatpush.bf16.msra.mxu0 %v475_v3  ;;  %511 = vmatpush.bf16.msra.mxu1 %v475_v3 }
   0xf   :  { %512 = vmatpush.bf16.msra.mxu2 %v475_v3  ;;  %513 = vmatpush.bf16.msra.mxu3 %v475_v3 }
  0x12   :  { %210 = vmatpush.bf16.msra.mxu0 %v474_v4  ;;  %514 = vmatpush.bf16.msra.mxu1 %v474_v4 }
  0x13   :  { %515 = vmatpush.bf16.msra.mxu2 %v474_v4  ;;  %516 = vmatpush.bf16.msra.mxu3 %v474_v4 }
  0x16   :  { %211 = vmatpush.bf16.msra.mxu0 %v473_v5  ;;  %517 = vmatpush.bf16.msra.mxu1 %v473_v5 }
  0x17   :  { %518 = vmatpush.bf16.msra.mxu2 %v473_v5  ;;  %519 = vmatpush.bf16.msra.mxu3 %v473_v5 }
  0x1a   :  { %212 = vmatpush.bf16.msra.mxu0 %v472_v6  ;;  %520 = vmatpush.bf16.msra.mxu1 %v472_v6 }
  0x1b   :  { %521 = vmatpush.bf16.msra.mxu2 %v472_v6  ;;  %522 = vmatpush.bf16.msra.mxu3 %v472_v6 }
  0x1e   :  { %213 = vmatpush.bf16.msra.mxu0 %v471_v7  ;;  %523 = vmatpush.bf16.msra.mxu1 %v471_v7 }
  0x1f   :  { %524 = vmatpush.bf16.msra.mxu2 %v471_v7  ;;  %525 = vmatpush.bf16.msra.mxu3 %v471_v7 }
  0x21   :  { %214 = vmatmul.bf16.vlgmr.msra.gmra.mxu0 %v455_v8  ;;  %234 = vmatmul.bf16.vlgmr.msra.gmra.mxu1 %v459_v9 }
  0x22   :  { %254 = vmatmul.bf16.vlgmr.msra.gmra.mxu2 %v463_v10  ;;  %274 = vmatmul.bf16.vlgmr.msra.gmra.mxu3 %v467_v11 }
  0x31   :  { %219 = vmatmul.bf16.gmra.mxu0 %v456_v12  ;;  %239 = vmatmul.bf16.gmra.mxu1 %v460_v13 }
  0x32   :  { %259 = vmatmul.bf16.gmra.mxu2 %v464_v14  ;;  %279 = vmatmul.bf16.gmra.mxu3 %v468_v15 }
  0x41   :  { %224 = vmatmul.bf16.gmra.mxu0 %v457_v16  ;;  %244 = vmatmul.bf16.gmra.mxu1 %v461_v17 }
  0x42   :  { %264 = vmatmul.bf16.gmra.mxu2 %v465_v18  ;;  %284 = vmatmul.bf16.gmra.mxu3 %v469_v19 }
  0x51   :  { %229 = vmatmul.bf16.gmra.mxu0 %v458_v20  ;;  %249 = vmatmul.bf16.gmra.mxu1 %v462_v21 }
  0x52   :  { %269 = vmatmul.bf16.gmra.mxu2 %v466_v22  ;;  %289 = vmatmul.bf16.gmra.mxu3 %v470_v23 }
  0x9e   :  { %v215_v24 = vpop.f32.mrf.mxu0  ;;  %v235_v25 = vpop.f32.mrf.mxu1 }
  0x9f   :  { %v295_v30 = vmax.f32 %v215_v24, %v235_v25 }
  0xa5   :  { %v255_v26 = vpop.f32.mrf.mxu2  ;;  %v275_v27 = vpop.f32.mrf.mxu3 }
  0xa6   :  { %v217_v28 = vpop.f32.mrf.mxu0  ;;  %v237_v29 = vpop.f32.mrf.mxu1  ;;  %v303_v31 = vmax.f32 %v255_v26, %v275_v27 }
  0xa7   :  { %v296_v36 = vmax.f32 %v217_v28, %v237_v29 }
  0xa8   :  { %v311_v32 = vmax.f32 %v295_v30, %v303_v31 }
  0xaa   :  { %v323_v40 = vadd.f32 %v622_v33, %v311_v32 }
  0xac   :  { %v331_v43 = vmax.f32 %v323_v40, 0.0 }
  0xad   :  { %v257_v34 = vpop.f32.mrf.mxu2  ;;  %v277_v35 = vpop.f32.mrf.mxu3 }
  0xae   :  { %v304_v37 = vmax.f32 %v257_v34, %v277_v35  ;;  %v220_v38 = vpop.f32.mrf.mxu0  ;;  %v240_v39 = vpop.f32.mrf.mxu1 }
  0xaf   :  { %v297_v50 = vmax.f32 %v220_v38, %v240_v39 }
  0xb0   :  { %v312_v41 = vmax.f32 %v296_v36, %v304_v37 }
  0xb2   :  { %v324_v42 = vadd.f32 %v622_v33, %v312_v41 }
  0xb4   :  { %v332_v44 = vmax.f32 %v324_v42, 0.0 }
  0xb5   :  { %v260_v45 = vpop.f32.mrf.mxu2  ;;  %v280_v46 = vpop.f32.mrf.mxu3 }
  0xb6   :  { %v482_v47 = vpack.c.bf16 %v332_v44, %v331_v43  ;;  %v222_v48 = vpop.f32.mrf.mxu0  ;;  %v242_v49 = vpop.f32.mrf.mxu1  ;;  %v305_v51 = vmax.f32 %v260_v45, %v280_v46 }
  0xb7   :  { %v298_v55 = vmax.f32 %v222_v48, %v242_v49 }
  0xb8   :  { %483 = vst [vmem:[%s647_s3] sm:$0xff] %v482_v47   ;;  %v313_v52 = vmax.f32 %v297_v50, %v305_v51 }
  0xba   :  { %v325_v59 = vadd.f32 %v622_v33, %v313_v52 }
  0xbc   :  { %v333_v62 = vmax.f32 %v325_v59, 0.0 }
  0xbd   :  { %v262_v53 = vpop.f32.mrf.mxu2  ;;  %v282_v54 = vpop.f32.mrf.mxu3 }
  0xbe   :  { %v306_v56 = vmax.f32 %v262_v53, %v282_v54  ;;  %v225_v57 = vpop.f32.mrf.mxu0  ;;  %v245_v58 = vpop.f32.mrf.mxu1 }
  0xbf   :  { %v299_v5 = vmax.f32 %v225_v57, %v245_v58 }
  0xc0   :  { %v314_v60 = vmax.f32 %v298_v55, %v306_v56 }
  0xc2   :  { %v326_v61 = vadd.f32 %v622_v33, %v314_v60 }
  0xc4   :  { %v334_v63 = vmax.f32 %v326_v61, 0.0 }
  0xc5   :  { %v265_v0 = vpop.f32.mrf.mxu2  ;;  %v285_v1 = vpop.f32.mrf.mxu3 }
  0xc6   :  { %v487_v2 = vpack.c.bf16 %v334_v63, %v333_v62  ;;  %v227_v3 = vpop.f32.mrf.mxu0  ;;  %v247_v4 = vpop.f32.mrf.mxu1  ;;  %v307_v6 = vmax.f32 %v265_v0, %v285_v1 }
  0xc7   :  { %v300_v10 = vmax.f32 %v227_v3, %v247_v4 }
  0xc8   :  { %499 = vst [vmem:[%s647_s3 + $0x8] sm:$0xff] %v487_v2   ;;  %v315_v7 = vmax.f32 %v299_v5, %v307_v6 }
  0xca   :  { %v327_v12 = vadd.f32 %v622_v33, %v315_v7 }
  0xcc   :  { %v335_v17 = vmax.f32 %v327_v12, 0.0 }
  0xcd   :  { %v267_v8 = vpop.f32.mrf.mxu2  ;;  %v287_v9 = vpop.f32.mrf.mxu3 }
  0xce   :  { %v308_v11 = vmax.f32 %v267_v8, %v287_v9  ;;  %v230_v14 = vpop.f32.mrf.mxu0  ;;  %v250_v15 = vpop.f32.mrf.mxu1 }
  0xcf   :  { %v301_v22 = vmax.f32 %v230_v14, %v250_v15 }
  0xd0   :  { %v316_v13 = vmax.f32 %v300_v10, %v308_v11 }
  0xd2   :  { %v328_v16 = vadd.f32 %v622_v33, %v316_v13 }
  0xd4   :  { %v336_v18 = vmax.f32 %v328_v16, 0.0 }
  0xd5   :  { %v270_v19 = vpop.f32.mrf.mxu2  ;;  %v290_v20 = vpop.f32.mrf.mxu3 }
  0xd6   :  { %v492_v21 = vpack.c.bf16 %v336_v18, %v335_v17  ;;  %v309_v23 = vmax.f32 %v270_v19, %v290_v20  ;;  %v232_v24 = vpop.f32.mrf.mxu0  ;;  %v252_v25 = vpop.f32.mrf.mxu1 }
  0xd7   :  { %v302_v29 = vmax.f32 %v232_v24, %v252_v25 }
  0xd8   :  { %500 = vst [vmem:[%s647_s3 + $0x10] sm:$0xff] %v492_v21   ;;  %v317_v26 = vmax.f32 %v301_v22, %v309_v23 }
  0xda   :  { %v329_v31 = vadd.f32 %v622_v33, %v317_v26 }
  0xdc   :  { %v337_v35 = vmax.f32 %v329_v31, 0.0 }
  0xdd   :  { %v272_v27 = vpop.f32.mrf.mxu2  ;;  %v292_v28 = vpop.f32.mrf.mxu3 }
  0xde   :  { %v310_v30 = vmax.f32 %v272_v27, %v292_v28 }
  0xe0   :  { %v318_v32 = vmax.f32 %v302_v29, %v310_v30 }
  0xe2   :  { %v330_v34 = vadd.f32 %v622_v33, %v318_v32 }
  0xe4   :  { %v338_v36 = vmax.f32 %v330_v34, 0.0 }
  0xe6   :  { %v497_v37 = vpack.c.bf16 %v338_v36, %v337_v35 }
  0xe8   :  { %501 = vst [vmem:[%s647_s3 + $0x18] sm:$0xff] %v497_v37  }

// kernel: lenet_pallas.5
= control target key start
LH: loop header
LB: loop body
LE: loop exit
PB: predicated region body
PF: predicated region fallthrough
CT: control target
= control target key end

     0   :  { %s970_s1 = inlined_call_operand.vmem [shape: bf16[512,128], index: 1, kind: input, shape index: {}]   ;;  %s971_s2 = inlined_call_operand.vmem [shape: f32[1,128], index: 2, kind: input, shape index: {}]   ;;  %s972_s0 = inlined_call_operand.vmem [shape: bf16[8,512], index: 0, kind: input, shape index: {}]   ;;  %s973_s3 = inlined_call_operand.vmem [shape: bf16[128,128], index: 3, kind: input, shape index: {}]   ;;  %s974_s4 = inlined_call_operand.vmem [shape: f32[1,128], index: 4, kind: input, shape index: {}]   ;;  %s975_s5 = inlined_call_operand.vmem [shape: bf16[128,128], index: 5, kind: input, shape index: {}]   ;;  %s976_s6 = inlined_call_operand.vmem [shape: f32[1,128], index: 6, kind: input, shape index: {}]   ;;  %s977_s7 = inlined_call_operand.vmem [shape: f32[8,128], index: 7, kind: output, shape index: {}]  }
   0x1   :  { %v724_v0 = vld [vmem:[%s970_s1 + $0x38] sm:$0xff]  ;;  %v723_v4 = vld [vmem:[%s970_s1 + $0x30] sm:$0xff]  ;;  %v722_v8 = vld [vmem:[%s970_s1 + $0x28] sm:$0xff] }
   0x2   :  { %v732_v1 = vld [vmem:[%s970_s1 + $0x78] sm:$0xff]  ;;  %302 = vmatpush.bf16.msra.mxu0 %v724_v0  ;;  %v731_v5 = vld [vmem:[%s970_s1 + $0x70] sm:$0xff]  ;;  %v730_v9 = vld [vmem:[%s970_s1 + $0x68] sm:$0xff] }
   0x3   :  { %v740_v2 = vld [vmem:[%s970_s1 + $0xb8] sm:$0xff]  ;;  %315 = vmatpush.bf16.msra.mxu1 %v732_v1  ;;  %v739_v6 = vld [vmem:[%s970_s1 + $0xb0] sm:$0xff]  ;;  %v738_v10 = vld [vmem:[%s970_s1 + $0xa8] sm:$0xff] }
   0x4   :  { %v748_v3 = vld [vmem:[%s970_s1 + $0xf8] sm:$0xff]  ;;  %328 = vmatpush.bf16.msra.mxu2 %v740_v2  ;;  %v747_v7 = vld [vmem:[%s970_s1 + $0xf0] sm:$0xff]  ;;  %v746_v11 = vld [vmem:[%s970_s1 + $0xe8] sm:$0xff] }
   0x5   :  { %341 = vmatpush.bf16.msra.mxu3 %v748_v3  ;;  %v721_v12 = vld [vmem:[%s970_s1 + $0x20] sm:$0xff]  ;;  %v720_v16 = vld [vmem:[%s970_s1 + $0x18] sm:$0xff]  ;;  %v719_v20 = vld [vmem:[%s970_s1 + $0x10] sm:$0xff] }
   0x6   :  { %303 = vmatpush.bf16.msra.mxu0 %v723_v4  ;;  %v729_v13 = vld [vmem:[%s970_s1 + $0x60] sm:$0xff]  ;;  %v728_v17 = vld [vmem:[%s970_s1 + $0x58] sm:$0xff]  ;;  %v727_v21 = vld [vmem:[%s970_s1 + $0x50] sm:$0xff] }
   0x7   :  { %316 = vmatpush.bf16.msra.mxu1 %v731_v5  ;;  %v737_v14 = vld [vmem:[%s970_s1 + $0xa0] sm:$0xff]  ;;  %v736_v18 = vld [vmem:[%s970_s1 + $0x98] sm:$0xff]  ;;  %v735_v22 = vld [vmem:[%s970_s1 + $0x90] sm:$0xff] }
   0x8   :  { %329 = vmatpush.bf16.msra.mxu2 %v739_v6  ;;  %v745_v15 = vld [vmem:[%s970_s1 + $0xe0] sm:$0xff]  ;;  %v744_v19 = vld [vmem:[%s970_s1 + $0xd8] sm:$0xff]  ;;  %v743_v23 = vld [vmem:[%s970_s1 + $0xd0] sm:$0xff] }
   0x9   :  { %342 = vmatpush.bf16.msra.mxu3 %v747_v7  ;;  %v718_v24 = vld [vmem:[%s970_s1 + $0x8] sm:$0xff]  ;;  %v26_v26 = vld [vmem:[%s972_s0] sm:$0xff]  ;;  %v756_v38 = vld [vmem:[%s973_s3 + $0x38] sm:$0xff] }
   0xa   :  { %304 = vmatpush.bf16.msra.mxu0 %v722_v8  ;;  %v726_v25 = vld [vmem:[%s970_s1 + $0x48] sm:$0xff]  ;;  %v98_v30 = vunpack.c.l.b16 %v26_v26  ;;  %v99_v31 = vunpack.c.h.b16 %v26_v26  ;;  %v717_v32 = vld [vmem:[%s970_s1] sm:$0xff]  ;;  %v755_v43 = vld [vmem:[%s973_s3 + $0x30] sm:$0xff] }
   0xb   :  { %317 = vmatpush.bf16.msra.mxu1 %v730_v9  ;;  %v734_v27 = vld [vmem:[%s970_s1 + $0x88] sm:$0xff]  ;;  %v725_v33 = vld [vmem:[%s970_s1 + $0x40] sm:$0xff]  ;;  %v752_v46 = vld [vmem:[%s973_s3 + $0x18] sm:$0xff] }
   0xc   :  { %330 = vmatpush.bf16.msra.mxu2 %v738_v10  ;;  %v742_v28 = vld [vmem:[%s970_s1 + $0xc8] sm:$0xff]  ;;  %v733_v36 = vld [vmem:[%s970_s1 + $0x80] sm:$0xff]  ;;  %v102_v39 = vpack.c.b16 %v98_v30, %v98_v30  ;;  %v103_v40 = vpack.c.b16 %v99_v31, %v99_v31  ;;  %v751_v47 = vld [vmem:[%s973_s3 + $0x10] sm:$0xff] }
   0xd   :  { %343 = vmatpush.bf16.msra.mxu3 %v746_v11  ;;  %v27_v29 = vld [vmem:[%s972_s0 + $0x8] sm:$0xff]  ;;  %v741_v37 = vld [vmem:[%s970_s1 + $0xc0] sm:$0xff]  ;;  %v764_v50 = vld [vmem:[%s975_s5 + $0x38] sm:$0xff] }
   0xe   :  { %305 = vmatpush.bf16.msra.mxu0 %v721_v12  ;;  %v100_v34 = vunpack.c.l.b16 %v27_v29  ;;  %v101_v35 = vunpack.c.h.b16 %v27_v29  ;;  %v754_v44 = vld [vmem:[%s973_s3 + $0x28] sm:$0xff]  ;;  %v753_v45 = vld [vmem:[%s973_s3 + $0x20] sm:$0xff]  ;;  %v763_v51 = vld [vmem:[%s975_s5 + $0x30] sm:$0xff] }
   0xf   :  { %318 = vmatpush.bf16.msra.mxu1 %v729_v13  ;;  %v750_v48 = vld [vmem:[%s973_s3 + $0x8] sm:$0xff]  ;;  %v749_v49 = vld [vmem:[%s973_s3] sm:$0xff]  ;;  %v760_v55 = vld [vmem:[%s975_s5 + $0x18] sm:$0xff] }
  0x10   :  { %331 = vmatpush.bf16.msra.mxu2 %v737_v14  ;;  %v104_v41 = vpack.c.b16 %v100_v34, %v100_v34  ;;  %v105_v42 = vpack.c.b16 %v101_v35, %v101_v35  ;;  %v762_v52 = vld [vmem:[%s975_s5 + $0x28] sm:$0xff]  ;;  %v761_v53 = vld [vmem:[%s975_s5 + $0x20] sm:$0xff]  ;;  %v759_v59 = vld [vmem:[%s975_s5 + $0x10] sm:$0xff] }
  0x11   :  { %344 = vmatpush.bf16.msra.mxu3 %v745_v15  ;;  %v765_v54 = vld [vmem:[%s971_s2] ss:$0 sm:$0xff]  ;;  %v758_v7 = vld [vmem:[%s975_s5 + $0x8] sm:$0xff] }
  0x12   :  { %306 = vmatpush.bf16.msra.mxu0 %v720_v16  ;;  %v757_v8 = vld [vmem:[%s975_s5] sm:$0xff] }
  0x13   :  { %319 = vmatpush.bf16.msra.mxu1 %v728_v17  ;;  %v766_v9 = vld [vmem:[%s974_s4] ss:$0 sm:$0xff] }
  0x14   :  { %332 = vmatpush.bf16.msra.mxu2 %v736_v18  ;;  %v767_v15 = vld [vmem:[%s976_s6] ss:$0 sm:$0xff] }
  0x15   :  { %345 = vmatpush.bf16.msra.mxu3 %v744_v19 }
  0x16   :  { %307 = vmatpush.bf16.msra.mxu0 %v719_v20 }
  0x17   :  { %320 = vmatpush.bf16.msra.mxu1 %v727_v21 }
  0x18   :  { %333 = vmatpush.bf16.msra.mxu2 %v735_v22 }
  0x19   :  { %346 = vmatpush.bf16.msra.mxu3 %v743_v23 }
  0x1a   :  { %308 = vmatpush.bf16.msra.mxu0 %v718_v24 }
  0x1b   :  { %321 = vmatpush.bf16.msra.mxu1 %v726_v25 }
  0x1c   :  { %334 = vmatpush.bf16.msra.mxu2 %v734_v27 }
  0x1d   :  { %347 = vmatpush.bf16.msra.mxu3 %v742_v28 }
  0x1e   :  { %309 = vmatpush.bf16.msra.mxu0 %v717_v32 }
  0x1f   :  { %322 = vmatpush.bf16.msra.mxu1 %v725_v33 }
  0x20   :  { %335 = vmatpush.bf16.msra.mxu2 %v733_v36 }
  0x21   :  { %348 = vmatpush.bf16.msra.mxu3 %v741_v37  ;;  %310 = vmatmul.bf16.vlgmr.msra.gmra.mxu0 %v102_v39 }
  0x22   :  { %424 = vmatpush.bf16.msrb.mxu0 %v756_v38  ;;  %323 = vmatmul.bf16.vlgmr.msra.gmra.mxu1 %v103_v40 }
  0x23   :  { %336 = vmatmul.bf16.vlgmr.msra.gmra.mxu2 %v104_v41  ;;  %507 = vmatpush.bf16.msrb.mxu1 %v764_v50 }
  0x24   :  { %349 = vmatmul.bf16.vlgmr.msra.gmra.mxu3 %v105_v42 }
  0x26   :  { %425 = vmatpush.bf16.msrb.mxu0 %v755_v43 }
  0x27   :  { %508 = vmatpush.bf16.msrb.mxu1 %v763_v51 }
  0x2a   :  { %426 = vmatpush.bf16.msrb.mxu0 %v754_v44 }
  0x2b   :  { %509 = vmatpush.bf16.msrb.mxu1 %v762_v52 }
  0x2e   :  { %427 = vmatpush.bf16.msrb.mxu0 %v753_v45 }
  0x2f   :  { %510 = vmatpush.bf16.msrb.mxu1 %v761_v53 }
  0x32   :  { %428 = vmatpush.bf16.msrb.mxu0 %v752_v46 }
  0x33   :  { %511 = vmatpush.bf16.msrb.mxu1 %v760_v55 }
  0x36   :  { %429 = vmatpush.bf16.msrb.mxu0 %v751_v47 }
  0x37   :  { %512 = vmatpush.bf16.msrb.mxu1 %v759_v59 }
  0x3a   :  { %430 = vmatpush.bf16.msrb.mxu0 %v750_v48 }
  0x3b   :  { %513 = vmatpush.bf16.msrb.mxu1 %v758_v7 }
  0x3e   :  { %431 = vmatpush.bf16.msrb.mxu0 %v749_v49 }
  0x3f   :  { %514 = vmatpush.bf16.msrb.mxu1 %v757_v8 }
  0x9e   :  { %v311_v56 = vpop.f32.mrf.mxu0 }
  0x9f   :  { %v324_v57 = vpop.f32.mrf.mxu1  ;;  %v312_v58 = vadd.f32 %v765_v54, %v311_v56 }
  0xa1   :  { %v325_v60 = vadd.f32 %v324_v57, %v312_v58 }
  0xa6   :  { %v337_v61 = vpop.f32.mrf.mxu2  ;;  %v313_v0 = vpop.f32.mrf.mxu0 }
  0xa7   :  { %v350_v62 = vpop.f32.mrf.mxu3  ;;  %v338_v63 = vadd.f32 %v337_v61, %v325_v60  ;;  %v326_v1 = vpop.f32.mrf.mxu1 }
  0xa9   :  { %v351_v2 = vadd.f32 %v350_v62, %v338_v63 }
  0xab   :  { %v354_v3 = vmax.f32 %v351_v2, 0.0 }
  0xad   :  { %v355_v4 = vpack.c.bf16 %v354_v3, %v354_v3 }
  0xae   :  { %v339_v5 = vpop.f32.mrf.mxu2 }
  0xaf   :  { %v352_v6 = vpop.f32.mrf.mxu3  ;;  %432 = vmatmul.bf16.vlgmr.msrb.gmra.mxu0 %v355_v4 }
 0x12c   :  { %v433_v10 = vpop.f32.mrf.mxu0 }
 0x12d   :  { %v434_v11 = vadd.f32 %v766_v9, %v433_v10 }
 0x12f   :  { %v437_v12 = vmax.f32 %v434_v11, 0.0 }
 0x131   :  { %v438_v13 = vpack.c.bf16 %v437_v12, %v437_v12 }
 0x133   :  { %515 = vmatmul.bf16.vlgmr.msrb.gmra.mxu1 %v438_v13 }
 0x134   :  { %v435_v14 = vpop.f32.mrf.mxu0 }
 0x1b0   :  { %v516_v16 = vpop.f32.mrf.mxu1 }
 0x1b1   :  { %v517_v17 = vadd.f32 %v767_v15, %v516_v16 }
 0x1b3   :  { %520 = vst [vmem:[%s977_s7] sm:$0xff] %v517_v17 }
 0x1b8   :  { %v518_v18 = vpop.f32.mrf.mxu1 }

</bundles_post_ra>
